<compile_context>
chip_gen: v6e
topology: v6e:2x2x1
jax: 0.10.0
libtpu: 0.0.40
codegen_flags: <defaults>
</compile_context>

<pallas_src>
import functools
import math

import jax
import jax.numpy as jnp
from jax.experimental import pallas as pl
from jax.experimental.pallas import tpu as pltpu

LN_EPS = 1e-12          # config.layer_norm_eps
_MAX_FULL_TILE = 4096   # guard: never silently take a full dim bigger than this as a tile


def _gelu(x):
    # tanh-approximation GELU (original google-research BERT "gelu")
    return 0.5 * x * (1.0 + jnp.tanh(jnp.sqrt(2.0 / jnp.pi) * (x + 0.044715 * x * x * x)))


# ---------------- tile-size helpers (256-aligned preference, guarded fallback) ----------------
def _pick_row_tile(dim, target):
    """Largest multiple of 8 dividing `dim`, <= target; full dim if small; guarded fallback."""
    if dim <= target:
        return dim
    t = (min(target, dim) // 8) * 8
    while t >= 8:
        if dim % t == 0:
            return t
        t -= 8
    if dim > _MAX_FULL_TILE:
        raise ValueError(f"no row tile divides {dim}; pad rows to a multiple of 8")
    return dim


def _pick_lane_tile(dim, target):
    """Largest divisor of `dim` <= target, preferring 256-multiples (MXU-aligned), then 128."""
    if dim <= target:
        return dim
    for align in (256, 128):
        t = (min(target, dim) // align) * align
        while t >= align:
            if dim % t == 0:
                return t
            t -= align
    if dim > _MAX_FULL_TILE:
        raise ValueError(f"no lane tile divides {dim}; pad lanes to a multiple of 128")
    return dim


# ---------------- tiled dense (linear) kernel: y = act(x @ w + b) ----------------
def _dense_kernel(act, x_ref, w_ref, b_ref, o_ref, acc_ref):
    k = pl.program_id(2)

    @pl.when(k == 0)
    def _():
        acc_ref[...] = jnp.zeros_like(acc_ref)

    acc_ref[...] += jnp.dot(x_ref[...], w_ref[...], preferred_element_type=jnp.float32)

    @pl.when(k == pl.num_programs(2) - 1)
    def _():
        y = acc_ref[...] + b_ref[...].astype(jnp.float32)
        if act is not None:
            y = act(y)
        o_ref[...] = y.astype(o_ref.dtype)


def dense(x, w, b, act=None, tm=256, tn=768, tk=768):
    # v5e note: raising tm to 512 on the large GEMMs amortizes the epilogue store further.
    M, K = x.shape
    Nout = w.shape[1]
    tm = _pick_row_tile(M, tm)
    tn = _pick_lane_tile(Nout, tn)
    tk = _pick_lane_tile(K, tk)
    grid = (M // tm, Nout // tn, K // tk)
    return pl.pallas_call(
        functools.partial(_dense_kernel, act),
        out_shape=jax.ShapeDtypeStruct((M, Nout), x.dtype),
        grid=grid,
        in_specs=[
            pl.BlockSpec((tm, tk), lambda i, j, k: (i, k)),
            pl.BlockSpec((tk, tn), lambda i, j, k: (k, j)),
            pl.BlockSpec((1, tn), lambda i, j, k: (0, j)),
        ],
        out_specs=pl.BlockSpec((tm, tn), lambda i, j, k: (i, j)),
        scratch_shapes=[pltpu.VMEM((tm, tn), jnp.float32)],
        compiler_params=pltpu.CompilerParams(
            dimension_semantics=("parallel", "parallel", "arbitrary")),
    )(x, w, b.reshape(1, Nout))


# ---------------- fused dense + residual + LayerNorm: LN(x @ w + b + res) ----------------
def _dense_res_ln_kernel(eps, x_ref, w_ref, b_ref, r_ref, g_ref, bb_ref, o_ref, acc_ref):
    k = pl.program_id(1)

    @pl.when(k == 0)
    def _():
        acc_ref[...] = jnp.zeros_like(acc_ref)

    acc_ref[...] += jnp.dot(x_ref[...], w_ref[...], preferred_element_type=jnp.float32)

    @pl.when(k == pl.num_programs(1) - 1)
    def _():
        y = acc_ref[...] + b_ref[...].astype(jnp.float32) + r_ref[...].astype(jnp.float32)
        mu = jnp.mean(y, axis=-1, keepdims=True)
        var = jnp.mean(jnp.square(y - mu), axis=-1, keepdims=True)
        yn = (y - mu) * jax.lax.rsqrt(var + eps)
        o_ref[...] = (yn * g_ref[...].astype(jnp.float32)
                      + bb_ref[...].astype(jnp.float32)).astype(o_ref.dtype)


def dense_res_ln(x, w, b, res, gamma, beta, tm=256, tk=768):
    M, K = x.shape
    H = w.shape[1]  # output width == hidden, kept whole so LN sees the full row
    tm = _pick_row_tile(M, tm)
    tk = _pick_lane_tile(K, tk)
    grid = (M // tm, K // tk)
    return pl.pallas_call(
        functools.partial(_dense_res_ln_kernel, LN_EPS),
        out_shape=jax.ShapeDtypeStruct((M, H), x.dtype),
        grid=grid,
        in_specs=[
            pl.BlockSpec((tm, tk), lambda i, k: (i, k)),
            pl.BlockSpec((tk, H), lambda i, k: (k, 0)),
            pl.BlockSpec((1, H), lambda i, k: (0, 0)),
            pl.BlockSpec((tm, H), lambda i, k: (i, 0)),
            pl.BlockSpec((1, H), lambda i, k: (0, 0)),
            pl.BlockSpec((1, H), lambda i, k: (0, 0)),
        ],
        out_specs=pl.BlockSpec((tm, H), lambda i, k: (i, 0)),
        scratch_shapes=[pltpu.VMEM((tm, H), jnp.float32)],
        compiler_params=pltpu.CompilerParams(
            dimension_semantics=("parallel", "arbitrary")),
    )(x, w, b.reshape(1, H), res, gamma, beta)


# ---------------- fully fused FFN: LN(gelu(x@w1+b1)@w2 + b2 + x) ----------------
# Grid (M/tm, I/ti): per ti step compute the (tm, ti) GELU intermediate in VMEM only and
# accumulate its contribution to the (tm, H) output; LN epilogue at the last ti step.
# The (M, I) intermediate never touches HBM. x doubles as the residual (same block).
def _ffn_res_ln_kernel(eps, x_ref, w1_ref, b1_ref, w2_ref, b2_ref, g_ref, bb_ref,
                       o_ref, acc_ref):
    j = pl.program_id(1)

    @pl.when(j == 0)
    def _():
        acc_ref[...] = jnp.zeros_like(acc_ref)

    h = jnp.dot(x_ref[...], w1_ref[...], preferred_element_type=jnp.float32)   # (tm, ti)
    h = _gelu(h + b1_ref[...].astype(jnp.float32))
    acc_ref[...] += jnp.dot(h.astype(w2_ref.dtype), w2_ref[...],
                            preferred_element_type=jnp.float32)                # (tm, H)

    @pl.when(j == pl.num_programs(1) - 1)
    def _():
        y = acc_ref[...] + b2_ref[...].astype(jnp.float32) + x_ref[...].astype(jnp.float32)
        mu = jnp.mean(y, axis=-1, keepdims=True)
        var = jnp.mean(jnp.square(y - mu), axis=-1, keepdims=True)
        yn = (y - mu) * jax.lax.rsqrt(var + eps)
        o_ref[...] = (yn * g_ref[...].astype(jnp.float32)
                      + bb_ref[...].astype(jnp.float32)).astype(o_ref.dtype)


def ffn_res_ln(x, w1, b1, w2, b2, gamma, beta, tm=256, ti=1024):
    M, H = x.shape
    I = w1.shape[1]
    tm = _pick_row_tile(M, tm)
    ti = _pick_lane_tile(I, ti)
    grid = (M // tm, I // ti)
    return pl.pallas_call(
        functools.partial(_ffn_res_ln_kernel, LN_EPS),
        out_shape=jax.ShapeDtypeStruct((M, H), x.dtype),
        grid=grid,
        in_specs=[
            pl.BlockSpec((tm, H), lambda i, j: (i, 0)),     # x (residual too); DMA'd once per i
            pl.BlockSpec((H, ti), lambda i, j: (0, j)),     # w1 column block
            pl.BlockSpec((1, ti), lambda i, j: (0, j)),     # b1 block
            pl.BlockSpec((ti, H), lambda i, j: (j, 0)),     # w2 row block
            pl.BlockSpec((1, H), lambda i, j: (0, 0)),      # b2
            pl.BlockSpec((1, H), lambda i, j: (0, 0)),      # gamma
            pl.BlockSpec((1, H), lambda i, j: (0, 0)),      # beta
        ],
        out_specs=pl.BlockSpec((tm, H), lambda i, j: (i, 0)),
        scratch_shapes=[pltpu.VMEM((tm, H), jnp.float32)],
        compiler_params=pltpu.CompilerParams(
            dimension_semantics=("parallel", "arbitrary")),
    )(x, w1, b1.reshape(1, I), w2, b2.reshape(1, H), gamma, beta)


# ---------------- row-tiled LayerNorm (embeddings, no residual) ----------------
def _ln_kernel(eps, x_ref, g_ref, b_ref, o_ref):
    x = x_ref[...].astype(jnp.float32)
    mu = jnp.mean(x, axis=-1, keepdims=True)
    var = jnp.mean(jnp.square(x - mu), axis=-1, keepdims=True)
    y = (x - mu) * jax.lax.rsqrt(var + eps)
    o_ref[...] = (y * g_ref[...].astype(jnp.float32)
                  + b_ref[...].astype(jnp.float32)).astype(o_ref.dtype)


def layernorm(x, gamma, beta, tm=1024):
    M, H = x.shape
    tm = _pick_row_tile(M, tm)
    return pl.pallas_call(
        functools.partial(_ln_kernel, LN_EPS),
        out_shape=jax.ShapeDtypeStruct((M, H), x.dtype),
        grid=(M // tm,),
        in_specs=[
            pl.BlockSpec((tm, H), lambda i: (i, 0)),
            pl.BlockSpec((1, H), lambda i: (0, 0)),
            pl.BlockSpec((1, H), lambda i: (0, 0)),
        ],
        out_specs=pl.BlockSpec((tm, H), lambda i: (i, 0)),
        compiler_params=pltpu.CompilerParams(dimension_semantics=("parallel",)),
    )(x, gamma, beta)


# ---------------- multi-head self-attention kernel (heads batched, K lane-dense) ----------------
def _attn_kernel(scale, q_ref, kt_ref, v_ref, bias_ref, o_ref):
    q = q_ref[...]                                   # (nh, tq, dh) bf16
    kt = kt_ref[...]                                 # (nh, dh, S)  bf16, lane-dense S
    v = v_ref[...]                                   # (nh, S,  dh)
    # natural MXU contraction: no per-tile XLU transpose of K
    s = jnp.einsum("hqd,hds->hqs", q, kt,
                   preferred_element_type=jnp.float32)            # (nh, tq, S) f32
    s = s * scale + bias_ref[...]                    # scale in f32; bias precomputed f32 (1,1,S)
    s = s - jnp.max(s, axis=-1, keepdims=True)
    p = jnp.exp(s)
    denom = jnp.sum(p, axis=-1, keepdims=True)
    p = p * pl.reciprocal(denom, approx=True)        # EUP reciprocal instead of VALU divide
    ctx = jnp.einsum("hqs,hsd->hqd", p.astype(v.dtype), v,
                     preferred_element_type=jnp.float32)          # (nh, tq, dh)
    o_ref[...] = ctx.astype(o_ref.dtype)


def attention(q, kt, v, bias3, num_heads, tq=128):
    # q: (N*nh, S, dh), kt: (N*nh, dh, S) lane-dense, v: (N*nh, S, dh), bias3: (N, 1, S) f32
    # tq capped at 128 so (nh, tq, S) f32 scores stay within v7x's VMEM budget at long S.
    NH, S, dh = q.shape
    nh = num_heads
    N = NH // nh
    tq = _pick_row_tile(S, tq)
    scale = 1.0 / math.sqrt(dh)
    return pl.pallas_call(
        functools.partial(_attn_kernel, scale),
        out_shape=jax.ShapeDtypeStruct((NH, S, dh), q.dtype),
        grid=(N, S // tq),
        in_specs=[
            pl.BlockSpec((nh, tq, dh), lambda n, qb: (n, qb, 0)),
            pl.BlockSpec((nh, dh, S), lambda n, qb: (n, 0, 0)),
            pl.BlockSpec((nh, S, dh), lambda n, qb: (n, 0, 0)),
            pl.BlockSpec((1, 1, S), lambda n, qb: (n, 0, 0)),
        ],
        out_specs=pl.BlockSpec((nh, tq, dh), lambda n, qb: (n, qb, 0)),
        # sequences parallel (megacore shards K/V DMA by sequence), q-tiles arbitrary
        compiler_params=pltpu.CompilerParams(
            dimension_semantics=("parallel", "arbitrary")),
    )(q, kt, v, bias3)


# ---------------- parameter init (deterministic, matches init_bert_weights) ----------------
def init_bert_params(key, cfg):
    H, I, L = cfg["hidden"], cfg["intermediate"], cfg["layers"]
    std = 0.02  # config.initializer_range
    keys = iter(jax.random.split(key, 128))

    def nrm(shape, dtype=jnp.bfloat16):
        return (jax.random.normal(next(keys), shape, jnp.float32) * std).astype(dtype)

    zeros_f = lambda n: jnp.zeros((n,), jnp.float32)
    params = dict(
        word_emb=nrm((cfg["vocab"], H)),
        pos_emb=nrm((cfg["max_pos"], H)),
        tok_emb=nrm((cfg["type_vocab"], H)),
        emb_ln_g=jnp.ones((1, H), jnp.float32),
        emb_ln_b=jnp.zeros((1, H), jnp.float32),
        pool_w=nrm((H, H)), pool_b=zeros_f(H),
        cls_w=nrm((H, 1), jnp.float32), cls_b=zeros_f(1),
        layers=[],
    )
    for _ in range(L):
        params["layers"].append(dict(
            wqkv=nrm((H, 3 * H)), bqkv=zeros_f(3 * H),   # fused Q|K|V projection
            wo=nrm((H, H)), bo=zeros_f(H),
            ln1_g=jnp.ones((1, H), jnp.float32), ln1_b=jnp.zeros((1, H), jnp.float32),
            w1=nrm((H, I)), b1=zeros_f(I),
            w2=nrm((I, H)), b2=zeros_f(H),
            ln2_g=jnp.ones((1, H), jnp.float32), ln2_b=jnp.zeros((1, H), jnp.float32),
        ))
    return params


# ---------------- BertForMultipleChoice forward ----------------
def bert_for_multiple_choice_forward(params, input_ids, token_type_ids=None,
                                     attention_mask=None, num_heads=4):
    B, C, S = input_ids.shape
    H = params["word_emb"].shape[1]
    N = B * C
    nh = num_heads
    dh = H // nh

    # flatten choices into batch (input_ids.view(-1, seq_len))
    flat_ids = input_ids.reshape(N, S)
    flat_tt = (token_type_ids.reshape(N, S) if token_type_ids is not None
               else jnp.zeros_like(flat_ids))
    # NOTE: this module's BertModel uses (input_ids > 0) as the default mask (not all-ones).
    if attention_mask is None:
        mask = (flat_ids > 0).astype(jnp.float32)
    else:
        mask = attention_mask.reshape(N, S).astype(jnp.float32)
    # precompute additive bias once in f32 (hoisted out of the attention kernel)
    bias3 = ((1.0 - mask) * -10000.0).reshape(N, 1, S).astype(jnp.float32)

    # BertEmbeddings: word + position + token_type, then LayerNorm (dropout = identity)
    pos = jnp.arange(S)
    emb = (jnp.take(params["word_emb"], flat_ids, axis=0)
           + params["pos_emb"][pos][None, :, :]
           + jnp.take(params["tok_emb"], flat_tt, axis=0))      # gather is plain-JAX glue
    x = layernorm(emb.reshape(N * S, H), params["emb_ln_g"], params["emb_ln_b"])

    # BertEncoder
    # TODO(synk): head split/merge relayouts stay in XLA (HBM round trips) — moving them
    # into the kernel requires rank-3 major-dim transposes whose Mosaic lowering is not
    # guaranteed at these head sizes.
    for lp in params["layers"]:
        qkv = dense(x, lp["wqkv"], lp["bqkv"])                   # fused QKV: (N*S, 3H)
        qkv = qkv.reshape(N, S, 3, nh, dh)
        q = jnp.transpose(qkv[:, :, 0], (0, 2, 1, 3)).reshape(N * nh, S, dh)
        kt = jnp.transpose(qkv[:, :, 1], (0, 2, 3, 1)).reshape(N * nh, dh, S)  # lane-dense K
        v = jnp.transpose(qkv[:, :, 2], (0, 2, 1, 3)).reshape(N * nh, S, dh)
        ctx = attention(q, kt, v, bias3, nh)                     # (N*nh, S, dh)
        ctx = jnp.transpose(ctx.reshape(N, nh, S, dh), (0, 2, 1, 3)).reshape(N * S, H)
        # attn output proj + residual + LN1 fused (attn dropout = identity)
        x = dense_res_ln(ctx, lp["wo"], lp["bo"], x, lp["ln1_g"], lp["ln1_b"])
        # fully fused FFN: GELU intermediate never hits HBM (dropout = identity)
        x = ffn_res_ln(x, lp["w1"], lp["b1"], lp["w2"], lp["b2"], lp["ln2_g"], lp["ln2_b"])

    # Pooler: first-token hidden -> Linear -> tanh (config.last_fn='tanh')
    seq0 = x.reshape(N, S, H)[:, 0, :]
    pooled = dense(seq0, params["pool_w"], params["pool_b"], act=jnp.tanh)

    # dropout(pooled) = identity at inference; classifier Linear(H, 1) in plain JAX f32
    # (degenerate 1-lane output not worth a Pallas kernel).
    logits = pooled.astype(jnp.float32) @ params["cls_w"] + params["cls_b"]
    # TODO(synk): labels path (CrossEntropyLoss) not implemented; returns reshaped logits.
    return logits.reshape(B, C)


if __name__ == "__main__":
    cfg = dict(vocab=100, hidden=32, layers=2, heads=4,
               intermediate=64, max_pos=64, type_vocab=2)
    key = jax.random.PRNGKey(0)
    pkey, ikey, tkey = jax.random.split(key, 3)
    params = init_bert_params(pkey, cfg)

    B, C, S = 2, 3, 8  # batch=2, num_choices=3, seq_len=8
    input_ids = jax.random.randint(ikey, (B, C, S), 0, cfg["vocab"], dtype=jnp.int32)
    token_type_ids = jax.random.randint(tkey, (B, C, S), 0, cfg["type_vocab"], dtype=jnp.int32)

    fwd = jax.jit(functools.partial(bert_for_multiple_choice_forward,
                                    num_heads=cfg["heads"]))
    logits = fwd(params, input_ids, token_type_ids)
    jax.block_until_ready(logits)
    assert logits.shape == (B, C) and logits.dtype == jnp.float32
    print("KERNEL_OK")
</pallas_src>

<mosaic_0001>
module attributes {stable_mosaic.version = 11 : i64} {
  func.func @_ln_kernel(%arg0: i32, %arg1: memref<48x32xbf16, #tpu.memory_space<vmem>>, %arg2: memref<1x32xf32, #tpu.memory_space<vmem>>, %arg3: memref<1x32xf32, #tpu.memory_space<vmem>>, %arg4: memref<48x32xbf16, #tpu.memory_space<vmem>>) attributes {dimension_semantics = [#tpu.dimension_semantics<parallel>], iteration_bounds = array<i64: 1>, scalar_prefetch = 0 : i64, scratch_operands = 0 : i64, tpu.core_type = #tpu.core_type<tc>, window_params = [{transform_indices = @transform_0, window_bounds = array<i64: 48, 32>}, {pipeline_mode = #tpu.pipeline_mode<synchronous>, transform_indices = @transform_1, window_bounds = array<i64: 1, 32>}, {pipeline_mode = #tpu.pipeline_mode<synchronous>, transform_indices = @transform_2, window_bounds = array<i64: 1, 32>}, {transform_indices = @transform_3, window_bounds = array<i64: 48, 32>}]} {
    %c0 = arith.constant 0 : index
    %c0_0 = arith.constant 0 : index
    %0 = vector.load %arg1[%c0, %c0_0] : memref<48x32xbf16, #tpu.memory_space<vmem>>, vector<48x32xbf16>
    %1 = arith.extf %0 : vector<48x32xbf16> to vector<48x32xf32>
    %cst = arith.constant dense<0.000000e+00> : vector<48xf32>
    %2 = vector.multi_reduction <add>, %1, %cst [1] : vector<48x32xf32> to vector<48xf32>
    %3 = vector.shape_cast %2 : vector<48xf32> to vector<48x1xf32>
    %cst_1 = arith.constant 3.200000e+01 : f32
    %4 = vector.broadcast %cst_1 : f32 to vector<48x1xf32>
    %5 = arith.divf %3, %4 : vector<48x1xf32>
    %6 = vector.broadcast %5 : vector<48x1xf32> to vector<48x32xf32>
    %7 = arith.subf %1, %6 : vector<48x32xf32>
    %8 = arith.mulf %7, %7 : vector<48x32xf32>
    %cst_2 = arith.constant dense<0.000000e+00> : vector<48xf32>
    %9 = vector.multi_reduction <add>, %8, %cst_2 [1] : vector<48x32xf32> to vector<48xf32>
    %10 = vector.shape_cast %9 : vector<48xf32> to vector<48x1xf32>
    %cst_3 = arith.constant 3.200000e+01 : f32
    %11 = vector.broadcast %cst_3 : f32 to vector<48x1xf32>
    %12 = arith.divf %10, %11 : vector<48x1xf32>
    %13 = vector.broadcast %5 : vector<48x1xf32> to vector<48x32xf32>
    %14 = arith.subf %1, %13 : vector<48x32xf32>
    %cst_4 = arith.constant 9.99999996E-13 : f32
    %15 = vector.broadcast %cst_4 : f32 to vector<48x1xf32>
    %16 = arith.addf %12, %15 : vector<48x1xf32>
    %17 = math.rsqrt %16 : vector<48x1xf32>
    %18 = vector.broadcast %17 : vector<48x1xf32> to vector<48x32xf32>
    %19 = arith.mulf %14, %18 : vector<48x32xf32>
    %c0_5 = arith.constant 0 : index
    %c0_6 = arith.constant 0 : index
    %20 = vector.load %arg2[%c0_5, %c0_6] : memref<1x32xf32, #tpu.memory_space<vmem>>, vector<1x32xf32>
    %21 = vector.broadcast %20 : vector<1x32xf32> to vector<48x32xf32>
    %22 = arith.mulf %19, %21 : vector<48x32xf32>
    %c0_7 = arith.constant 0 : index
    %c0_8 = arith.constant 0 : index
    %23 = vector.load %arg3[%c0_7, %c0_8] : memref<1x32xf32, #tpu.memory_space<vmem>>, vector<1x32xf32>
    %24 = vector.broadcast %23 : vector<1x32xf32> to vector<48x32xf32>
    %25 = arith.addf %22, %24 : vector<48x32xf32>
    %26 = arith.truncf %25 : vector<48x32xf32> to vector<48x32xbf16>
    %c0_9 = arith.constant 0 : index
    %c0_10 = arith.constant 0 : index
    %27 = vector.load %arg4[%c0_9, %c0_10] : memref<48x32xbf16, #tpu.memory_space<vmem>>, vector<48x32xbf16>
    tpu.vector_store %arg4[%c0_9, %c0_10], %26 {strides = array<i32>} : memref<48x32xbf16, #tpu.memory_space<vmem>>, vector<48x32xbf16>,
    return
  }
  func.func @transform_0(%arg0: i32) -> (i32, i32) {
    %c0_i32 = arith.constant 0 : i32
    %c0_i32_0 = arith.constant 0 : i32
    return %arg0, %c0_i32 : i32, i32
  }
  func.func @transform_1(%arg0: i32) -> (i32, i32) {
    %c0_i32 = arith.constant 0 : i32
    %c0_i32_0 = arith.constant 0 : i32
    %c0_i32_1 = arith.constant 0 : i32
    return %c0_i32, %c0_i32_0 : i32, i32
  }
  func.func @transform_2(%arg0: i32) -> (i32, i32) {
    %c0_i32 = arith.constant 0 : i32
    %c0_i32_0 = arith.constant 0 : i32
    %c0_i32_1 = arith.constant 0 : i32
    return %c0_i32, %c0_i32_0 : i32, i32
  }
  func.func @transform_3(%arg0: i32) -> (i32, i32) {
    %c0_i32 = arith.constant 0 : i32
    %c0_i32_0 = arith.constant 0 : i32
    return %arg0, %c0_i32 : i32, i32
  }
}

module attributes {stable_mosaic.version = 11 : i64} {
  func.func @_dense_kernel(%arg0: i32, %arg1: i32, %arg2: i32, %arg3: memref<48x32xbf16, #tpu.memory_space<vmem>>, %arg4: memref<32x96xbf16, #tpu.memory_space<vmem>>, %arg5: memref<1x96xf32, #tpu.memory_space<vmem>>, %arg6: memref<48x96xbf16, #tpu.memory_space<vmem>>, %arg7: memref<48x96xf32, #tpu.memory_space<vmem>>) attributes {dimension_semantics = [#tpu.dimension_semantics<parallel>, #tpu.dimension_semantics<parallel>, #tpu.dimension_semantics<arbitrary>], iteration_bounds = array<i64: 1, 1, 1>, scalar_prefetch = 0 : i64, scratch_operands = 1 : i64, tpu.core_type = #tpu.core_type<tc>, window_params = [{transform_indices = @transform_0, window_bounds = array<i64: 48, 32>}, {transform_indices = @transform_1, window_bounds = array<i64: 32, 96>}, {transform_indices = @transform_2, window_bounds = array<i64: 1, 96>}, {transform_indices = @transform_3, window_bounds = array<i64: 48, 96>}]} {
    %c0_i32 = arith.constant 0 : i32
    %0 = arith.cmpi eq, %arg2, %c0_i32 : i32
    %1 = arith.extui %0 : i1 to i32
    %c0_i32_0 = arith.constant 0 : i32
    %2 = arith.cmpi ne, %1, %c0_i32_0 : i32
    scf.if %2 {
      %cst_10 = arith.constant 0.000000e+00 : f32
      %12 = vector.broadcast %cst_10 : f32 to vector<48x96xf32>
      %c0_11 = arith.constant 0 : index
      %c0_12 = arith.constant 0 : index
      %13 = vector.load %arg7[%c0_11, %c0_12] : memref<48x96xf32, #tpu.memory_space<vmem>>, vector<48x96xf32>
      tpu.vector_store %arg7[%c0_11, %c0_12], %12 {strides = array<i32>} : memref<48x96xf32, #tpu.memory_space<vmem>>, vector<48x96xf32>,
    } else {
    }
    %c0 = arith.constant 0 : index
    %c0_1 = arith.constant 0 : index
    %3 = vector.load %arg7[%c0, %c0_1] : memref<48x96xf32, #tpu.memory_space<vmem>>, vector<48x96xf32>
    %c0_2 = arith.constant 0 : index
    %c0_3 = arith.constant 0 : index
    %4 = vector.load %arg3[%c0_2, %c0_3] : memref<48x32xbf16, #tpu.memory_space<vmem>>, vector<48x32xbf16>
    %c0_4 = arith.constant 0 : index
    %c0_5 = arith.constant 0 : index
    %5 = vector.load %arg4[%c0_4, %c0_5] : memref<32x96xbf16, #tpu.memory_space<vmem>>, vector<32x96xbf16>
    %cst = arith.constant dense<0.000000e+00> : vector<48x96xf32>
    %6 = tpu.matmul %4, %5, %cst {dimension_numbers = #tpu.dot_dimension_numbers<[1], [0], [0], [1], [0, 0, 1, 1], [], []>} : vector<48x32xbf16>, vector<32x96xbf16>, vector<48x96xf32> -> vector<48x96xf32>
    %7 = arith.addf %3, %6 : vector<48x96xf32>
    %c0_6 = arith.constant 0 : index
    %c0_7 = arith.constant 0 : index
    %8 = vector.load %arg7[%c0_6, %c0_7] : memref<48x96xf32, #tpu.memory_space<vmem>>, vector<48x96xf32>
    tpu.vector_store %arg7[%c0_6, %c0_7], %7 {strides = array<i32>} : memref<48x96xf32, #tpu.memory_space<vmem>>, vector<48x96xf32>,
    %c0_i32_8 = arith.constant 0 : i32
    %9 = arith.cmpi eq, %arg2, %c0_i32_8 : i32
    %10 = arith.extui %9 : i1 to i32
    %c0_i32_9 = arith.constant 0 : i32
    %11 = arith.cmpi ne, %10, %c0_i32_9 : i32
    scf.if %11 {
      %c0_10 = arith.constant 0 : index
      %c0_11 = arith.constant 0 : index
      %12 = vector.load %arg7[%c0_10, %c0_11] : memref<48x96xf32, #tpu.memory_space<vmem>>, vector<48x96xf32>
      %c0_12 = arith.constant 0 : index
      %c0_13 = arith.constant 0 : index
      %13 = vector.load %arg5[%c0_12, %c0_13] : memref<1x96xf32, #tpu.memory_space<vmem>>, vector<1x96xf32>
      %14 = vector.broadcast %13 : vector<1x96xf32> to vector<48x96xf32>
      %15 = arith.addf %12, %14 : vector<48x96xf32>
      %16 = arith.truncf %15 : vector<48x96xf32> to vector<48x96xbf16>
      %c0_14 = arith.constant 0 : index
      %c0_15 = arith.constant 0 : index
      %17 = vector.load %arg6[%c0_14, %c0_15] : memref<48x96xbf16, #tpu.memory_space<vmem>>, vector<48x96xbf16>
      tpu.vector_store %arg6[%c0_14, %c0_15], %16 {strides = array<i32>} : memref<48x96xbf16, #tpu.memory_space<vmem>>, vector<48x96xbf16>,
    } else {
    }
    return
  }
  func.func @transform_0(%arg0: i32, %arg1: i32, %arg2: i32) -> (i32, i32) {
    %c0_i32 = arith.constant 0 : i32
    return %arg0, %arg2 : i32, i32
  }
  func.func @transform_1(%arg0: i32, %arg1: i32, %arg2: i32) -> (i32, i32) {
    %c0_i32 = arith.constant 0 : i32
    return %arg2, %arg1 : i32, i32
  }
  func.func @transform_2(%arg0: i32, %arg1: i32, %arg2: i32) -> (i32, i32) {
    %c0_i32 = arith.constant 0 : i32
    %c0_i32_0 = arith.constant 0 : i32
    return %c0_i32, %arg1 : i32, i32
  }
  func.func @transform_3(%arg0: i32, %arg1: i32, %arg2: i32) -> (i32, i32) {
    %c0_i32 = arith.constant 0 : i32
    return %arg0, %arg1 : i32, i32
  }
}

module attributes {stable_mosaic.version = 11 : i64} {
  func.func @_attn_kernel(%arg0: i32, %arg1: i32, %arg2: memref<4x8x8xbf16, #tpu.memory_space<vmem>>, %arg3: memref<4x8x8xbf16, #tpu.memory_space<vmem>>, %arg4: memref<4x8x8xbf16, #tpu.memory_space<vmem>>, %arg5: memref<1x1x8xf32, #tpu.memory_space<vmem>>, %arg6: memref<4x8x8xbf16, #tpu.memory_space<vmem>>) attributes {dimension_semantics = [#tpu.dimension_semantics<parallel>, #tpu.dimension_semantics<arbitrary>], iteration_bounds = array<i64: 6, 1>, scalar_prefetch = 0 : i64, scratch_operands = 0 : i64, tpu.core_type = #tpu.core_type<tc>, window_params = [{transform_indices = @transform_0, window_bounds = array<i64: 4, 8, 8>}, {transform_indices = @transform_1, window_bounds = array<i64: 4, 8, 8>}, {transform_indices = @transform_2, window_bounds = array<i64: 4, 8, 8>}, {transform_indices = @transform_3, window_bounds = array<i64: 1, 1, 8>}, {transform_indices = @transform_4, window_bounds = array<i64: 4, 8, 8>}]} {
    %c0 = arith.constant 0 : index
    %c0_0 = arith.constant 0 : index
    %c0_1 = arith.constant 0 : index
    %0 = vector.load %arg2[%c0, %c0_0, %c0_1] : memref<4x8x8xbf16, #tpu.memory_space<vmem>>, vector<4x8x8xbf16>
    %c0_2 = arith.constant 0 : index
    %c0_3 = arith.constant 0 : index
    %c0_4 = arith.constant 0 : index
    %1 = vector.load %arg3[%c0_2, %c0_3, %c0_4] : memref<4x8x8xbf16, #tpu.memory_space<vmem>>, vector<4x8x8xbf16>
    %c0_5 = arith.constant 0 : index
    %c0_6 = arith.constant 0 : index
    %c0_7 = arith.constant 0 : index
    %2 = vector.load %arg4[%c0_5, %c0_6, %c0_7] : memref<4x8x8xbf16, #tpu.memory_space<vmem>>, vector<4x8x8xbf16>
    "tpu.trace_start"() <{level = 10 : i32, message = "hqd,hds->hqs"}> : () -> ()
    %cst = arith.constant dense<0.000000e+00> : vector<4x8x8xf32>
    %3 = tpu.matmul %0, %1, %cst {dimension_numbers = #tpu.dot_dimension_numbers<[2], [1], [1], [2], [0, 0, 0, 1, 1, 2], [0], [0]>} : vector<4x8x8xbf16>, vector<4x8x8xbf16>, vector<4x8x8xf32> -> vector<4x8x8xf32>
    "tpu.trace_stop"() : () -> ()
    %cst_8 = arith.constant 0.353553385 : f32
    %4 = vector.broadcast %cst_8 : f32 to vector<4x8x8xf32>
    %5 = arith.mulf %3, %4 : vector<4x8x8xf32>
    %c0_9 = arith.constant 0 : index
    %c0_10 = arith.constant 0 : index
    %c0_11 = arith.constant 0 : index
    %6 = vector.load %arg5[%c0_9, %c0_10, %c0_11] : memref<1x1x8xf32, #tpu.memory_space<vmem>>, vector<1x1x8xf32>
    %7 = vector.broadcast %6 : vector<1x1x8xf32> to vector<4x8x8xf32>
    %8 = arith.addf %5, %7 : vector<4x8x8xf32>
    %cst_12 = arith.constant dense<0xFF800000> : vector<4x8xf32>
    %9 = vector.multi_reduction <maximumf>, %8, %cst_12 [2] : vector<4x8x8xf32> to vector<4x8xf32>
    %10 = vector.shape_cast %9 : vector<4x8xf32> to vector<4x8x1xf32>
    %11 = vector.broadcast %10 : vector<4x8x1xf32> to vector<4x8x8xf32>
    %12 = arith.subf %8, %11 : vector<4x8x8xf32>
    %13 = math.exp %12 : vector<4x8x8xf32>
    %cst_13 = arith.constant dense<0.000000e+00> : vector<4x8xf32>
    %14 = vector.multi_reduction <add>, %13, %cst_13 [2] : vector<4x8x8xf32> to vector<4x8xf32>
    %15 = vector.shape_cast %14 : vector<4x8xf32> to vector<4x8x1xf32>
    %16 = tpu.reciprocal %15 {approx = true} : vector<4x8x1xf32> -> vector<4x8x1xf32>
    %17 = vector.broadcast %16 : vector<4x8x1xf32> to vector<4x8x8xf32>
    %18 = arith.mulf %13, %17 : vector<4x8x8xf32>
    %19 = arith.truncf %18 : vector<4x8x8xf32> to vector<4x8x8xbf16>
    "tpu.trace_start"() <{level = 10 : i32, message = "hqs,hsd->hqd"}> : () -> ()
    %cst_14 = arith.constant dense<0.000000e+00> : vector<4x8x8xf32>
    %20 = tpu.matmul %19, %2, %cst_14 {dimension_numbers = #tpu.dot_dimension_numbers<[2], [1], [1], [2], [0, 0, 0, 1, 1, 2], [0], [0]>} : vector<4x8x8xbf16>, vector<4x8x8xbf16>, vector<4x8x8xf32> -> vector<4x8x8xf32>
    "tpu.trace_stop"() : () -> ()
    %21 = arith.truncf %20 : vector<4x8x8xf32> to vector<4x8x8xbf16>
    %c0_15 = arith.constant 0 : index
    %c0_16 = arith.constant 0 : index
    %c0_17 = arith.constant 0 : index
    %22 = vector.load %arg6[%c0_15, %c0_16, %c0_17] : memref<4x8x8xbf16, #tpu.memory_space<vmem>>, vector<4x8x8xbf16>
    tpu.vector_store %arg6[%c0_15, %c0_16, %c0_17], %21 {strides = array<i32>} : memref<4x8x8xbf16, #tpu.memory_space<vmem>>, vector<4x8x8xbf16>,
    return
  }
  func.func @transform_0(%arg0: i32, %arg1: i32) -> (i32, i32, i32) {
    %c0_i32 = arith.constant 0 : i32
    %c0_i32_0 = arith.constant 0 : i32
    return %arg0, %arg1, %c0_i32 : i32, i32, i32
  }
  func.func @transform_1(%arg0: i32, %arg1: i32) -> (i32, i32, i32) {
    %c0_i32 = arith.constant 0 : i32
    %c0_i32_0 = arith.constant 0 : i32
    %c0_i32_1 = arith.constant 0 : i32
    return %arg0, %c0_i32, %c0_i32_0 : i32, i32, i32
  }
  func.func @transform_2(%arg0: i32, %arg1: i32) -> (i32, i32, i32) {
    %c0_i32 = arith.constant 0 : i32
    %c0_i32_0 = arith.constant 0 : i32
    %c0_i32_1 = arith.constant 0 : i32
    return %arg0, %c0_i32, %c0_i32_0 : i32, i32, i32
  }
  func.func @transform_3(%arg0: i32, %arg1: i32) -> (i32, i32, i32) {
    %c0_i32 = arith.constant 0 : i32
    %c0_i32_0 = arith.constant 0 : i32
    %c0_i32_1 = arith.constant 0 : i32
    return %arg0, %c0_i32, %c0_i32_0 : i32, i32, i32
  }
  func.func @transform_4(%arg0: i32, %arg1: i32) -> (i32, i32, i32) {
    %c0_i32 = arith.constant 0 : i32
    %c0_i32_0 = arith.constant 0 : i32
    return %arg0, %arg1, %c0_i32 : i32, i32, i32
  }
}

module attributes {stable_mosaic.version = 11 : i64} {
  func.func @_dense_res_ln_kernel(%arg0: i32, %arg1: i32, %arg2: memref<48x32xbf16, #tpu.memory_space<vmem>>, %arg3: memref<32x32xbf16, #tpu.memory_space<vmem>>, %arg4: memref<1x32xf32, #tpu.memory_space<vmem>>, %arg5: memref<48x32xbf16, #tpu.memory_space<vmem>>, %arg6: memref<1x32xf32, #tpu.memory_space<vmem>>, %arg7: memref<1x32xf32, #tpu.memory_space<vmem>>, %arg8: memref<48x32xbf16, #tpu.memory_space<vmem>>, %arg9: memref<48x32xf32, #tpu.memory_space<vmem>>) attributes {dimension_semantics = [#tpu.dimension_semantics<parallel>, #tpu.dimension_semantics<arbitrary>], iteration_bounds = array<i64: 1, 1>, scalar_prefetch = 0 : i64, scratch_operands = 1 : i64, tpu.core_type = #tpu.core_type<tc>, window_params = [{transform_indices = @transform_0, window_bounds = array<i64: 48, 32>}, {transform_indices = @transform_1, window_bounds = array<i64: 32, 32>}, {pipeline_mode = #tpu.pipeline_mode<synchronous>, transform_indices = @transform_2, window_bounds = array<i64: 1, 32>}, {transform_indices = @transform_3, window_bounds = array<i64: 48, 32>}, {pipeline_mode = #tpu.pipeline_mode<synchronous>, transform_indices = @transform_4, window_bounds = array<i64: 1, 32>}, {pipeline_mode = #tpu.pipeline_mode<synchronous>, transform_indices = @transform_5, window_bounds = array<i64: 1, 32>}, {transform_indices = @transform_6, window_bounds = array<i64: 48, 32>}]} {
    %c0_i32 = arith.constant 0 : i32
    %0 = arith.cmpi eq, %arg1, %c0_i32 : i32
    %1 = arith.extui %0 : i1 to i32
    %c0_i32_0 = arith.constant 0 : i32
    %2 = arith.cmpi ne, %1, %c0_i32_0 : i32
    scf.if %2 {
      %cst_10 = arith.constant 0.000000e+00 : f32
      %12 = vector.broadcast %cst_10 : f32 to vector<48x32xf32>
      %c0_11 = arith.constant 0 : index
      %c0_12 = arith.constant 0 : index
      %13 = vector.load %arg9[%c0_11, %c0_12] : memref<48x32xf32, #tpu.memory_space<vmem>>, vector<48x32xf32>
      tpu.vector_store %arg9[%c0_11, %c0_12], %12 {strides = array<i32>} : memref<48x32xf32, #tpu.memory_space<vmem>>, vector<48x32xf32>,
    } else {
    }
    %c0 = arith.constant 0 : index
    %c0_1 = arith.constant 0 : index
    %3 = vector.load %arg9[%c0, %c0_1] : memref<48x32xf32, #tpu.memory_space<vmem>>, vector<48x32xf32>
    %c0_2 = arith.constant 0 : index
    %c0_3 = arith.constant 0 : index
    %4 = vector.load %arg2[%c0_2, %c0_3] : memref<48x32xbf16, #tpu.memory_space<vmem>>, vector<48x32xbf16>
    %c0_4 = arith.constant 0 : index
    %c0_5 = arith.constant 0 : index
    %5 = vector.load %arg3[%c0_4, %c0_5] : memref<32x32xbf16, #tpu.memory_space<vmem>>, vector<32x32xbf16>
    %cst = arith.constant dense<0.000000e+00> : vector<48x32xf32>
    %6 = tpu.matmul %4, %5, %cst {dimension_numbers = #tpu.dot_dimension_numbers<[1], [0], [0], [1], [0, 0, 1, 1], [], []>} : vector<48x32xbf16>, vector<32x32xbf16>, vector<48x32xf32> -> vector<48x32xf32>
    %7 = arith.addf %3, %6 : vector<48x32xf32>
    %c0_6 = arith.constant 0 : index
    %c0_7 = arith.constant 0 : index
    %8 = vector.load %arg9[%c0_6, %c0_7] : memref<48x32xf32, #tpu.memory_space<vmem>>, vector<48x32xf32>
    tpu.vector_store %arg9[%c0_6, %c0_7], %7 {strides = array<i32>} : memref<48x32xf32, #tpu.memory_space<vmem>>, vector<48x32xf32>,
    %c0_i32_8 = arith.constant 0 : i32
    %9 = arith.cmpi eq, %arg1, %c0_i32_8 : i32
    %10 = arith.extui %9 : i1 to i32
    %c0_i32_9 = arith.constant 0 : i32
    %11 = arith.cmpi ne, %10, %c0_i32_9 : i32
    scf.if %11 {
      %c0_10 = arith.constant 0 : index
      %c0_11 = arith.constant 0 : index
      %12 = vector.load %arg9[%c0_10, %c0_11] : memref<48x32xf32, #tpu.memory_space<vmem>>, vector<48x32xf32>
      %c0_12 = arith.constant 0 : index
      %c0_13 = arith.constant 0 : index
      %13 = vector.load %arg4[%c0_12, %c0_13] : memref<1x32xf32, #tpu.memory_space<vmem>>, vector<1x32xf32>
      %14 = vector.broadcast %13 : vector<1x32xf32> to vector<48x32xf32>
      %15 = arith.addf %12, %14 : vector<48x32xf32>
      %c0_14 = arith.constant 0 : index
      %c0_15 = arith.constant 0 : index
      %16 = vector.load %arg5[%c0_14, %c0_15] : memref<48x32xbf16, #tpu.memory_space<vmem>>, vector<48x32xbf16>
      %17 = arith.extf %16 : vector<48x32xbf16> to vector<48x32xf32>
      %18 = arith.addf %15, %17 : vector<48x32xf32>
      %cst_16 = arith.constant dense<0.000000e+00> : vector<48xf32>
      %19 = vector.multi_reduction <add>, %18, %cst_16 [1] : vector<48x32xf32> to vector<48xf32>
      %20 = vector.shape_cast %19 : vector<48xf32> to vector<48x1xf32>
      %cst_17 = arith.constant 3.200000e+01 : f32
      %21 = vector.broadcast %cst_17 : f32 to vector<48x1xf32>
      %22 = arith.divf %20, %21 : vector<48x1xf32>
      %23 = vector.broadcast %22 : vector<48x1xf32> to vector<48x32xf32>
      %24 = arith.subf %18, %23 : vector<48x32xf32>
      %25 = arith.mulf %24, %24 : vector<48x32xf32>
      %cst_18 = arith.constant dense<0.000000e+00> : vector<48xf32>
      %26 = vector.multi_reduction <add>, %25, %cst_18 [1] : vector<48x32xf32> to vector<48xf32>
      %27 = vector.shape_cast %26 : vector<48xf32> to vector<48x1xf32>
      %cst_19 = arith.constant 3.200000e+01 : f32
      %28 = vector.broadcast %cst_19 : f32 to vector<48x1xf32>
      %29 = arith.divf %27, %28 : vector<48x1xf32>
      %30 = vector.broadcast %22 : vector<48x1xf32> to vector<48x32xf32>
      %31 = arith.subf %18, %30 : vector<48x32xf32>
      %cst_20 = arith.constant 9.99999996E-13 : f32
      %32 = vector.broadcast %cst_20 : f32 to vector<48x1xf32>
      %33 = arith.addf %29, %32 : vector<48x1xf32>
      %34 = math.rsqrt %33 : vector<48x1xf32>
      %35 = vector.broadcast %34 : vector<48x1xf32> to vector<48x32xf32>
      %36 = arith.mulf %31, %35 : vector<48x32xf32>
      %c0_21 = arith.constant 0 : index
      %c0_22 = arith.constant 0 : index
      %37 = vector.load %arg6[%c0_21, %c0_22] : memref<1x32xf32, #tpu.memory_space<vmem>>, vector<1x32xf32>
      %38 = vector.broadcast %37 : vector<1x32xf32> to vector<48x32xf32>
      %39 = arith.mulf %36, %38 : vector<48x32xf32>
      %c0_23 = arith.constant 0 : index
      %c0_24 = arith.constant 0 : index
      %40 = vector.load %arg7[%c0_23, %c0_24] : memref<1x32xf32, #tpu.memory_space<vmem>>, vector<1x32xf32>
      %41 = vector.broadcast %40 : vector<1x32xf32> to vector<48x32xf32>
      %42 = arith.addf %39, %41 : vector<48x32xf32>
      %43 = arith.truncf %42 : vector<48x32xf32> to vector<48x32xbf16>
      %c0_25 = arith.constant 0 : index
      %c0_26 = arith.constant 0 : index
      %44 = vector.load %arg8[%c0_25, %c0_26] : memref<48x32xbf16, #tpu.memory_space<vmem>>, vector<48x32xbf16>
      tpu.vector_store %arg8[%c0_25, %c0_26], %43 {strides = array<i32>} : memref<48x32xbf16, #tpu.memory_space<vmem>>, vector<48x32xbf16>,
    } else {
    }
    return
  }
  func.func @transform_0(%arg0: i32, %arg1: i32) -> (i32, i32) {
    %c0_i32 = arith.constant 0 : i32
    return %arg0, %arg1 : i32, i32
  }
  func.func @transform_1(%arg0: i32, %arg1: i32) -> (i32, i32) {
    %c0_i32 = arith.constant 0 : i32
    %c0_i32_0 = arith.constant 0 : i32
    return %arg1, %c0_i32 : i32, i32
  }
  func.func @transform_2(%arg0: i32, %arg1: i32) -> (i32, i32) {
    %c0_i32 = arith.constant 0 : i32
    %c0_i32_0 = arith.constant 0 : i32
    %c0_i32_1 = arith.constant 0 : i32
    return %c0_i32, %c0_i32_0 : i32, i32
  }
  func.func @transform_3(%arg0: i32, %arg1: i32) -> (i32, i32) {
    %c0_i32 = arith.constant 0 : i32
    %c0_i32_0 = arith.constant 0 : i32
    return %arg0, %c0_i32 : i32, i32
  }
  func.func @transform_4(%arg0: i32, %arg1: i32) -> (i32, i32) {
    %c0_i32 = arith.constant 0 : i32
    %c0_i32_0 = arith.constant 0 : i32
    %c0_i32_1 = arith.constant 0 : i32
    return %c0_i32, %c0_i32_0 : i32, i32
  }
  func.func @transform_5(%arg0: i32, %arg1: i32) -> (i32, i32) {
    %c0_i32 = arith.constant 0 : i32
    %c0_i32_0 = arith.constant 0 : i32
    %c0_i32_1 = arith.constant 0 : i32
    return %c0_i32, %c0_i32_0 : i32, i32
  }
  func.func @transform_6(%arg0: i32, %arg1: i32) -> (i32, i32) {
    %c0_i32 = arith.constant 0 : i32
    %c0_i32_0 = arith.constant 0 : i32
    return %arg0, %c0_i32 : i32, i32
  }
}

module attributes {stable_mosaic.version = 11 : i64} {
  func.func @_ffn_res_ln_kernel(%arg0: i32, %arg1: i32, %arg2: memref<48x32xbf16, #tpu.memory_space<vmem>>, %arg3: memref<32x64xbf16, #tpu.memory_space<vmem>>, %arg4: memref<1x64xf32, #tpu.memory_space<vmem>>, %arg5: memref<64x32xbf16, #tpu.memory_space<vmem>>, %arg6: memref<1x32xf32, #tpu.memory_space<vmem>>, %arg7: memref<1x32xf32, #tpu.memory_space<vmem>>, %arg8: memref<1x32xf32, #tpu.memory_space<vmem>>, %arg9: memref<48x32xbf16, #tpu.memory_space<vmem>>, %arg10: memref<48x32xf32, #tpu.memory_space<vmem>>) attributes {dimension_semantics = [#tpu.dimension_semantics<parallel>, #tpu.dimension_semantics<arbitrary>], iteration_bounds = array<i64: 1, 1>, scalar_prefetch = 0 : i64, scratch_operands = 1 : i64, tpu.core_type = #tpu.core_type<tc>, window_params = [{transform_indices = @transform_0, window_bounds = array<i64: 48, 32>}, {transform_indices = @transform_1, window_bounds = array<i64: 32, 64>}, {transform_indices = @transform_2, window_bounds = array<i64: 1, 64>}, {transform_indices = @transform_3, window_bounds = array<i64: 64, 32>}, {pipeline_mode = #tpu.pipeline_mode<synchronous>, transform_indices = @transform_4, window_bounds = array<i64: 1, 32>}, {pipeline_mode = #tpu.pipeline_mode<synchronous>, transform_indices = @transform_5, window_bounds = array<i64: 1, 32>}, {pipeline_mode = #tpu.pipeline_mode<synchronous>, transform_indices = @transform_6, window_bounds = array<i64: 1, 32>}, {transform_indices = @transform_7, window_bounds = array<i64: 48, 32>}]} {
    %c0_i32 = arith.constant 0 : i32
    %0 = arith.cmpi eq, %arg1, %c0_i32 : i32
    %1 = arith.extui %0 : i1 to i32
    %c0_i32_0 = arith.constant 0 : i32
    %2 = arith.cmpi ne, %1, %c0_i32_0 : i32
    scf.if %2 {
      %cst_19 = arith.constant 0.000000e+00 : f32
      %32 = vector.broadcast %cst_19 : f32 to vector<48x32xf32>
      %c0_20 = arith.constant 0 : index
      %c0_21 = arith.constant 0 : index
      %33 = vector.load %arg10[%c0_20, %c0_21] : memref<48x32xf32, #tpu.memory_space<vmem>>, vector<48x32xf32>
      tpu.vector_store %arg10[%c0_20, %c0_21], %32 {strides = array<i32>} : memref<48x32xf32, #tpu.memory_space<vmem>>, vector<48x32xf32>,
    } else {
    }
    %c0 = arith.constant 0 : index
    %c0_1 = arith.constant 0 : index
    %3 = vector.load %arg2[%c0, %c0_1] : memref<48x32xbf16, #tpu.memory_space<vmem>>, vector<48x32xbf16>
    %c0_2 = arith.constant 0 : index
    %c0_3 = arith.constant 0 : index
    %4 = vector.load %arg3[%c0_2, %c0_3] : memref<32x64xbf16, #tpu.memory_space<vmem>>, vector<32x64xbf16>
    %cst = arith.constant dense<0.000000e+00> : vector<48x64xf32>
    %5 = tpu.matmul %3, %4, %cst {dimension_numbers = #tpu.dot_dimension_numbers<[1], [0], [0], [1], [0, 0, 1, 1], [], []>} : vector<48x32xbf16>, vector<32x64xbf16>, vector<48x64xf32> -> vector<48x64xf32>
    %c0_4 = arith.constant 0 : index
    %c0_5 = arith.constant 0 : index
    %6 = vector.load %arg4[%c0_4, %c0_5] : memref<1x64xf32, #tpu.memory_space<vmem>>, vector<1x64xf32>
    %7 = vector.broadcast %6 : vector<1x64xf32> to vector<48x64xf32>
    %8 = arith.addf %5, %7 : vector<48x64xf32>
    %cst_6 = arith.constant 5.000000e-01 : f32
    %9 = vector.broadcast %cst_6 : f32 to vector<48x64xf32>
    %10 = arith.mulf %9, %8 : vector<48x64xf32>
    %cst_7 = arith.constant 0.636619746 : f32
    %11 = math.sqrt %cst_7 : f32
    %cst_8 = arith.constant 4.471500e-02 : f32
    %12 = vector.broadcast %cst_8 : f32 to vector<48x64xf32>
    %13 = arith.mulf %12, %8 : vector<48x64xf32>
    %14 = arith.mulf %13, %8 : vector<48x64xf32>
    %15 = arith.mulf %14, %8 : vector<48x64xf32>
    %16 = arith.addf %8, %15 : vector<48x64xf32>
    %17 = vector.broadcast %11 : f32 to vector<48x64xf32>
    %18 = arith.mulf %17, %16 : vector<48x64xf32>
    %19 = math.tanh %18 : vector<48x64xf32>
    %cst_9 = arith.constant 1.000000e+00 : f32
    %20 = vector.broadcast %cst_9 : f32 to vector<48x64xf32>
    %21 = arith.addf %20, %19 : vector<48x64xf32>
    %22 = arith.mulf %10, %21 : vector<48x64xf32>
    %c0_10 = arith.constant 0 : index
    %c0_11 = arith.constant 0 : index
    %23 = vector.load %arg10[%c0_10, %c0_11] : memref<48x32xf32, #tpu.memory_space<vmem>>, vector<48x32xf32>
    %24 = arith.truncf %22 : vector<48x64xf32> to vector<48x64xbf16>
    %c0_12 = arith.constant 0 : index
    %c0_13 = arith.constant 0 : index
    %25 = vector.load %arg5[%c0_12, %c0_13] : memref<64x32xbf16, #tpu.memory_space<vmem>>, vector<64x32xbf16>
    %cst_14 = arith.constant dense<0.000000e+00> : vector<48x32xf32>
    %26 = tpu.matmul %24, %25, %cst_14 {dimension_numbers = #tpu.dot_dimension_numbers<[1], [0], [0], [1], [0, 0, 1, 1], [], []>} : vector<48x64xbf16>, vector<64x32xbf16>, vector<48x32xf32> -> vector<48x32xf32>
    %27 = arith.addf %23, %26 : vector<48x32xf32>
    %c0_15 = arith.constant 0 : index
    %c0_16 = arith.constant 0 : index
    %28 = vector.load %arg10[%c0_15, %c0_16] : memref<48x32xf32, #tpu.memory_space<vmem>>, vector<48x32xf32>
    tpu.vector_store %arg10[%c0_15, %c0_16], %27 {strides = array<i32>} : memref<48x32xf32, #tpu.memory_space<vmem>>, vector<48x32xf32>,
    %c0_i32_17 = arith.constant 0 : i32
    %29 = arith.cmpi eq, %arg1, %c0_i32_17 : i32
    %30 = arith.extui %29 : i1 to i32
    %c0_i32_18 = arith.constant 0 : i32
    %31 = arith.cmpi ne, %30, %c0_i32_18 : i32
    scf.if %31 {
      %c0_19 = arith.constant 0 : index
      %c0_20 = arith.constant 0 : index
      %32 = vector.load %arg10[%c0_19, %c0_20] : memref<48x32xf32, #tpu.memory_space<vmem>>, vector<48x32xf32>
      %c0_21 = arith.constant 0 : index
      %c0_22 = arith.constant 0 : index
      %33 = vector.load %arg6[%c0_21, %c0_22] : memref<1x32xf32, #tpu.memory_space<vmem>>, vector<1x32xf32>
      %34 = vector.broadcast %33 : vector<1x32xf32> to vector<48x32xf32>
      %35 = arith.addf %32, %34 : vector<48x32xf32>
      %c0_23 = arith.constant 0 : index
      %c0_24 = arith.constant 0 : index
      %36 = vector.load %arg2[%c0_23, %c0_24] : memref<48x32xbf16, #tpu.memory_space<vmem>>, vector<48x32xbf16>
      %37 = arith.extf %36 : vector<48x32xbf16> to vector<48x32xf32>
      %38 = arith.addf %35, %37 : vector<48x32xf32>
      %cst_25 = arith.constant dense<0.000000e+00> : vector<48xf32>
      %39 = vector.multi_reduction <add>, %38, %cst_25 [1] : vector<48x32xf32> to vector<48xf32>
      %40 = vector.shape_cast %39 : vector<48xf32> to vector<48x1xf32>
      %cst_26 = arith.constant 3.200000e+01 : f32
      %41 = vector.broadcast %cst_26 : f32 to vector<48x1xf32>
      %42 = arith.divf %40, %41 : vector<48x1xf32>
      %43 = vector.broadcast %42 : vector<48x1xf32> to vector<48x32xf32>
      %44 = arith.subf %38, %43 : vector<48x32xf32>
      %45 = arith.mulf %44, %44 : vector<48x32xf32>
      %cst_27 = arith.constant dense<0.000000e+00> : vector<48xf32>
      %46 = vector.multi_reduction <add>, %45, %cst_27 [1] : vector<48x32xf32> to vector<48xf32>
      %47 = vector.shape_cast %46 : vector<48xf32> to vector<48x1xf32>
      %cst_28 = arith.constant 3.200000e+01 : f32
      %48 = vector.broadcast %cst_28 : f32 to vector<48x1xf32>
      %49 = arith.divf %47, %48 : vector<48x1xf32>
      %50 = vector.broadcast %42 : vector<48x1xf32> to vector<48x32xf32>
      %51 = arith.subf %38, %50 : vector<48x32xf32>
      %cst_29 = arith.constant 9.99999996E-13 : f32
      %52 = vector.broadcast %cst_29 : f32 to vector<48x1xf32>
      %53 = arith.addf %49, %52 : vector<48x1xf32>
      %54 = math.rsqrt %53 : vector<48x1xf32>
      %55 = vector.broadcast %54 : vector<48x1xf32> to vector<48x32xf32>
      %56 = arith.mulf %51, %55 : vector<48x32xf32>
      %c0_30 = arith.constant 0 : index
      %c0_31 = arith.constant 0 : index
      %57 = vector.load %arg7[%c0_30, %c0_31] : memref<1x32xf32, #tpu.memory_space<vmem>>, vector<1x32xf32>
      %58 = vector.broadcast %57 : vector<1x32xf32> to vector<48x32xf32>
      %59 = arith.mulf %56, %58 : vector<48x32xf32>
      %c0_32 = arith.constant 0 : index
      %c0_33 = arith.constant 0 : index
      %60 = vector.load %arg8[%c0_32, %c0_33] : memref<1x32xf32, #tpu.memory_space<vmem>>, vector<1x32xf32>
      %61 = vector.broadcast %60 : vector<1x32xf32> to vector<48x32xf32>
      %62 = arith.addf %59, %61 : vector<48x32xf32>
      %63 = arith.truncf %62 : vector<48x32xf32> to vector<48x32xbf16>
      %c0_34 = arith.constant 0 : index
      %c0_35 = arith.constant 0 : index
      %64 = vector.load %arg9[%c0_34, %c0_35] : memref<48x32xbf16, #tpu.memory_space<vmem>>, vector<48x32xbf16>
      tpu.vector_store %arg9[%c0_34, %c0_35], %63 {strides = array<i32>} : memref<48x32xbf16, #tpu.memory_space<vmem>>, vector<48x32xbf16>,
    } else {
    }
    return
  }
  func.func @transform_0(%arg0: i32, %arg1: i32) -> (i32, i32) {
    %c0_i32 = arith.constant 0 : i32
    %c0_i32_0 = arith.constant 0 : i32
    return %arg0, %c0_i32 : i32, i32
  }
  func.func @transform_1(%arg0: i32, %arg1: i32) -> (i32, i32) {
    %c0_i32 = arith.constant 0 : i32
    %c0_i32_0 = arith.constant 0 : i32
    return %c0_i32, %arg1 : i32, i32
  }
  func.func @transform_2(%arg0: i32, %arg1: i32) -> (i32, i32) {
    %c0_i32 = arith.constant 0 : i32
    %c0_i32_0 = arith.constant 0 : i32
    return %c0_i32, %arg1 : i32, i32
  }
  func.func @transform_3(%arg0: i32, %arg1: i32) -> (i32, i32) {
    %c0_i32 = arith.constant 0 : i32
    %c0_i32_0 = arith.constant 0 : i32
    return %arg1, %c0_i32 : i32, i32
  }
  func.func @transform_4(%arg0: i32, %arg1: i32) -> (i32, i32) {
    %c0_i32 = arith.constant 0 : i32
    %c0_i32_0 = arith.constant 0 : i32
    %c0_i32_1 = arith.constant 0 : i32
    return %c0_i32, %c0_i32_0 : i32, i32
  }
  func.func @transform_5(%arg0: i32, %arg1: i32) -> (i32, i32) {
    %c0_i32 = arith.constant 0 : i32
    %c0_i32_0 = arith.constant 0 : i32
    %c0_i32_1 = arith.constant 0 : i32
    return %c0_i32, %c0_i32_0 : i32, i32
  }
  func.func @transform_6(%arg0: i32, %arg1: i32) -> (i32, i32) {
    %c0_i32 = arith.constant 0 : i32
    %c0_i32_0 = arith.constant 0 : i32
    %c0_i32_1 = arith.constant 0 : i32
    return %c0_i32, %c0_i32_0 : i32, i32
  }
  func.func @transform_7(%arg0: i32, %arg1: i32) -> (i32, i32) {
    %c0_i32 = arith.constant 0 : i32
    %c0_i32_0 = arith.constant 0 : i32
    return %arg0, %c0_i32 : i32, i32
  }
}

module attributes {stable_mosaic.version = 11 : i64} {
  func.func @_dense_kernel(%arg0: i32, %arg1: i32, %arg2: i32, %arg3: memref<6x32xbf16, #tpu.memory_space<vmem>>, %arg4: memref<32x32xbf16, #tpu.memory_space<vmem>>, %arg5: memref<1x32xf32, #tpu.memory_space<vmem>>, %arg6: memref<6x32xbf16, #tpu.memory_space<vmem>>, %arg7: memref<6x32xf32, #tpu.memory_space<vmem>>) attributes {dimension_semantics = [#tpu.dimension_semantics<parallel>, #tpu.dimension_semantics<parallel>, #tpu.dimension_semantics<arbitrary>], iteration_bounds = array<i64: 1, 1, 1>, scalar_prefetch = 0 : i64, scratch_operands = 1 : i64, tpu.core_type = #tpu.core_type<tc>, window_params = [{transform_indices = @transform_0, window_bounds = array<i64: 6, 32>}, {transform_indices = @transform_1, window_bounds = array<i64: 32, 32>}, {transform_indices = @transform_2, window_bounds = array<i64: 1, 32>}, {transform_indices = @transform_3, window_bounds = array<i64: 6, 32>}]} {
    %c0_i32 = arith.constant 0 : i32
    %0 = arith.cmpi eq, %arg2, %c0_i32 : i32
    %1 = arith.extui %0 : i1 to i32
    %c0_i32_0 = arith.constant 0 : i32
    %2 = arith.cmpi ne, %1, %c0_i32_0 : i32
    scf.if %2 {
      %cst_10 = arith.constant 0.000000e+00 : f32
      %12 = vector.broadcast %cst_10 : f32 to vector<6x32xf32>
      %c0_11 = arith.constant 0 : index
      %c0_12 = arith.constant 0 : index
      %13 = vector.load %arg7[%c0_11, %c0_12] : memref<6x32xf32, #tpu.memory_space<vmem>>, vector<6x32xf32>
      tpu.vector_store %arg7[%c0_11, %c0_12], %12 {strides = array<i32>} : memref<6x32xf32, #tpu.memory_space<vmem>>, vector<6x32xf32>,
    } else {
    }
    %c0 = arith.constant 0 : index
    %c0_1 = arith.constant 0 : index
    %3 = vector.load %arg7[%c0, %c0_1] : memref<6x32xf32, #tpu.memory_space<vmem>>, vector<6x32xf32>
    %c0_2 = arith.constant 0 : index
    %c0_3 = arith.constant 0 : index
    %4 = vector.load %arg3[%c0_2, %c0_3] : memref<6x32xbf16, #tpu.memory_space<vmem>>, vector<6x32xbf16>
    %c0_4 = arith.constant 0 : index
    %c0_5 = arith.constant 0 : index
    %5 = vector.load %arg4[%c0_4, %c0_5] : memref<32x32xbf16, #tpu.memory_space<vmem>>, vector<32x32xbf16>
    %cst = arith.constant dense<0.000000e+00> : vector<6x32xf32>
    %6 = tpu.matmul %4, %5, %cst {dimension_numbers = #tpu.dot_dimension_numbers<[1], [0], [0], [1], [0, 0, 1, 1], [], []>} : vector<6x32xbf16>, vector<32x32xbf16>, vector<6x32xf32> -> vector<6x32xf32>
    %7 = arith.addf %3, %6 : vector<6x32xf32>
    %c0_6 = arith.constant 0 : index
    %c0_7 = arith.constant 0 : index
    %8 = vector.load %arg7[%c0_6, %c0_7] : memref<6x32xf32, #tpu.memory_space<vmem>>, vector<6x32xf32>
    tpu.vector_store %arg7[%c0_6, %c0_7], %7 {strides = array<i32>} : memref<6x32xf32, #tpu.memory_space<vmem>>, vector<6x32xf32>,
    %c0_i32_8 = arith.constant 0 : i32
    %9 = arith.cmpi eq, %arg2, %c0_i32_8 : i32
    %10 = arith.extui %9 : i1 to i32
    %c0_i32_9 = arith.constant 0 : i32
    %11 = arith.cmpi ne, %10, %c0_i32_9 : i32
    scf.if %11 {
      %c0_10 = arith.constant 0 : index
      %c0_11 = arith.constant 0 : index
      %12 = vector.load %arg7[%c0_10, %c0_11] : memref<6x32xf32, #tpu.memory_space<vmem>>, vector<6x32xf32>
      %c0_12 = arith.constant 0 : index
      %c0_13 = arith.constant 0 : index
      %13 = vector.load %arg5[%c0_12, %c0_13] : memref<1x32xf32, #tpu.memory_space<vmem>>, vector<1x32xf32>
      %14 = vector.broadcast %13 : vector<1x32xf32> to vector<6x32xf32>
      %15 = arith.addf %12, %14 : vector<6x32xf32>
      %16 = math.tanh %15 : vector<6x32xf32>
      %17 = arith.truncf %16 : vector<6x32xf32> to vector<6x32xbf16>
      %c0_14 = arith.constant 0 : index
      %c0_15 = arith.constant 0 : index
      %18 = vector.load %arg6[%c0_14, %c0_15] : memref<6x32xbf16, #tpu.memory_space<vmem>>, vector<6x32xbf16>
      tpu.vector_store %arg6[%c0_14, %c0_15], %17 {strides = array<i32>} : memref<6x32xbf16, #tpu.memory_space<vmem>>, vector<6x32xbf16>,
    } else {
    }
    return
  }
  func.func @transform_0(%arg0: i32, %arg1: i32, %arg2: i32) -> (i32, i32) {
    %c0_i32 = arith.constant 0 : i32
    return %arg0, %arg2 : i32, i32
  }
  func.func @transform_1(%arg0: i32, %arg1: i32, %arg2: i32) -> (i32, i32) {
    %c0_i32 = arith.constant 0 : i32
    return %arg2, %arg1 : i32, i32
  }
  func.func @transform_2(%arg0: i32, %arg1: i32, %arg2: i32) -> (i32, i32) {
    %c0_i32 = arith.constant 0 : i32
    %c0_i32_0 = arith.constant 0 : i32
    return %c0_i32, %arg1 : i32, i32
  }
  func.func @transform_3(%arg0: i32, %arg1: i32, %arg2: i32) -> (i32, i32) {
    %c0_i32 = arith.constant 0 : i32
    return %arg0, %arg1 : i32, i32
  }
}

</mosaic_0001>

<bundles_post_ra>
// kernel: bert_for_multiple_choice_forward.10
= control target key start
LH: loop header
LB: loop body
LE: loop exit
PB: predicated region body
PF: predicated region fallthrough
CT: control target
= control target key end

     0   :  { %vm26_vm0 = vcmask 261120   ;;  %vm156_vm1 = vcmask 257024   ;;  %s293_s0 = inlined_call_operand.vmem [shape: bf16[48,32], index: 0, kind: input, shape index: {}]   ;;  %s294_s1 = inlined_call_operand.vmem [shape: f32[1,32], index: 1, kind: input, shape index: {}]   ;;  %s295_s2 = inlined_call_operand.vmem [shape: f32[1,32], index: 2, kind: input, shape index: {}]   ;;  %s296_s3 = inlined_call_operand.vmem [shape: bf16[48,32], index: 3, kind: output, shape index: {}]  }
   0x1   :  { %v182_v0 = vld [vmem:[%s293_s0] sm:$0xff]   ;;  %v193_v1 = vld [vmem:[%s293_s0 + $0x8] sm:$0xff]   ;;  %v194_v6 = vld [vmem:[%s293_s0 + $0x10] sm:$0xff]  }
   0x2   :  { %v183_v2 = vunpack.c.l.bf16 %v182_v0  ;;  %v187_v3 = vunpack.c.l.bf16 %v193_v1  ;;  %v184_v4 = vunpack.c.h.bf16 %v182_v0  ;;  %v188_v5 = vunpack.c.h.bf16 %v193_v1  ;;  %v167_v0 = vld [vmem:[%s294_s1] ss:$0 sm:$0xff] }
   0x3   :  { %v191_v11 = vunpack.c.l.bf16 %v194_v6  ;;  %v192_v12 = vunpack.c.h.bf16 %v194_v6 }
   0x4   :  { %v27_v7 = vsel %vm26_vm0, %v183_v2, 0.0  ;;  %v33_v8 = vsel %vm26_vm0, %v187_v3, 0.0  ;;  %v30_v9 = vsel %vm26_vm0, %v184_v4, 0.0  ;;  %v36_v10 = vsel %vm26_vm0, %v188_v5, 0.0 }
   0x5   :  { %28 = vadd.xlane.f32.xlu0 %v27_v7  ;;  %34 = vadd.xlane.f32.xlu1 %v33_v8  ;;  %v39_v13 = vsel %vm26_vm0, %v191_v11, 0.0  ;;  %v42_v14 = vsel %vm26_vm0, %v192_v12, 0.0 }
   0x9   :  { %31 = vadd.xlane.f32.xlu0 %v30_v9  ;;  %37 = vadd.xlane.f32.xlu1 %v36_v10 }
   0xd   :  { %40 = vadd.xlane.f32.xlu0 %v39_v13  ;;  %43 = vadd.xlane.f32.xlu1 %v42_v14 }
  0x8e   :  { %v29_v15 = vpop.xlane.xlu0 %28  ;;  %v35_v16 = vpop.xlane.xlu1 %34 }
  0x8f   :  { %v46_v17 = vmul.f32 0.03125, %v29_v15  ;;  %v48_v18 = vmul.f32 0.03125, %v35_v16 }
  0x91   :  { %v52_v19 = vsub.f32 %v183_v2, %v46_v17  ;;  %v242_v20 = vsub.f32 %v187_v3, %v48_v18  ;;  %v168_v2 = vld [vmem:[%s295_s2] ss:$0 sm:$0xff] }
  0x92   :  { %v32_v21 = vpop.xlane.xlu0 %31  ;;  %v38_v22 = vpop.xlane.xlu1 %37 }
  0x93   :  { %v47_v23 = vmul.f32 0.03125, %v32_v21  ;;  %v49_v24 = vmul.f32 0.03125, %v38_v22  ;;  %v58_v25 = vmul.f32 %v52_v19, %v52_v19  ;;  %v60_v26 = vmul.f32 %v242_v20, %v242_v20 }
  0x95   :  { %v53_v27 = vsub.f32 %v184_v4, %v47_v23  ;;  %v246_v28 = vsub.f32 %v188_v5, %v49_v24  ;;  %v64_v29 = vsel %vm26_vm0, %v58_v25, 0.0  ;;  %v70_v32 = vsel %vm26_vm0, %v60_v26, 0.0 }
  0x96   :  { %65 = vadd.xlane.f32.xlu0 %v64_v29  ;;  %v41_v30 = vpop.xlane.xlu0 %40  ;;  %v44_v31 = vpop.xlane.xlu1 %43 }
  0x97   :  { %v50_v33 = vmul.f32 0.03125, %v41_v30  ;;  %v51_v34 = vmul.f32 0.03125, %v44_v31  ;;  %v59_v35 = vmul.f32 %v53_v27, %v53_v27  ;;  %v61_v36 = vmul.f32 %v246_v28, %v246_v28 }
  0x99   :  { %v56_v37 = vsub.f32 %v191_v11, %v50_v33  ;;  %v252_v38 = vsub.f32 %v192_v12, %v51_v34  ;;  %v67_v39 = vsel %vm26_vm0, %v59_v35, 0.0  ;;  %v73_v40 = vsel %vm26_vm0, %v61_v36, 0.0 }
  0x9a   :  { %71 = vadd.xlane.f32.xlu0 %v70_v32  ;;  %68 = vadd.xlane.f32.xlu1 %v67_v39 }
  0x9b   :  { %v62_v41 = vmul.f32 %v56_v37, %v56_v37  ;;  %v63_v42 = vmul.f32 %v252_v38, %v252_v38 }
  0x9d   :  { %v76_v43 = vsel %vm26_vm0, %v62_v41, 0.0  ;;  %v79_v44 = vsel %vm26_vm0, %v63_v42, 0.0 }
  0x9e   :  { %74 = vadd.xlane.f32.xlu1 %v73_v40  ;;  %77 = vadd.xlane.f32.xlu0 %v76_v43 }
  0xa2   :  { %80 = vadd.xlane.f32.xlu1 %v79_v44 }
 0x11f   :  { %v66_v45 = vpop.xlane.xlu0 %65 }
 0x120   :  { %v82_v46 = vmul.f32 0.03125, %v66_v45 }
 0x122   :  { %v88_v47 = vadd.f32 1e-12, %v82_v46 }
 0x123   :  { %v69_v48 = vpop.xlane.xlu1 %68  ;;  %v72_v49 = vpop.xlane.xlu0 %71 }
 0x124   :  { %195 = vrsqrt.f32 %v88_v47  ;;  %v83_v50 = vmul.f32 0.03125, %v69_v48  ;;  %v84_v51 = vmul.f32 0.03125, %v72_v49 }
 0x126   :  { %v89_v52 = vadd.f32 1e-12, %v83_v50  ;;  %v90_v53 = vadd.f32 1e-12, %v84_v51 }
 0x127   :  { %v75_v54 = vpop.xlane.xlu1 %74  ;;  %v78_v55 = vpop.xlane.xlu0 %77 }
 0x128   :  { %197 = vrsqrt.f32 %v89_v52  ;;  %v85_v56 = vmul.f32 0.03125, %v75_v54  ;;  %v86_v57 = vmul.f32 0.03125, %v78_v55 }
 0x129   :  { %199 = vrsqrt.f32 %v90_v53 }
 0x12a   :  { %v91_v58 = vadd.f32 1e-12, %v85_v56  ;;  %v92_v59 = vadd.f32 1e-12, %v86_v57 }
 0x12b   :  { %v81_v60 = vpop.xlane.xlu1 %80 }
 0x12c   :  { %201 = vrsqrt.f32 %v91_v58  ;;  %v87_v61 = vmul.f32 0.03125, %v81_v60 }
 0x12d   :  { %203 = vrsqrt.f32 %v92_v59 }
 0x12e   :  { %v93_v62 = vadd.f32 1e-12, %v87_v61 }
 0x130   :  { %205 = vrsqrt.f32 %v93_v62 }
 0x131   :  { %v196_v63 = vpop.eup %195 }
 0x132   :  { %v100_v1 = vmul.f32 %v196_v63, %v52_v19 }
 0x134   :  { %v113_v3 = vmul.f32 %v167_v0, %v100_v1 }
 0x135   :  { %v198_v4 = vpop.eup %197 }
 0x136   :  { %v200_v5 = vpop.eup %199  ;;  %v126_v6 = vadd.f32 %v168_v2, %v113_v3  ;;  %v101_v7 = vmul.f32 %v198_v4, %v53_v27 }
 0x137   :  { %v102_v8 = vmul.f32 %v200_v5, %v242_v20 }
 0x138   :  { %v175_v9 = vpack.c.bf16 %v126_v6, %v126_v6  ;;  %v114_v10 = vmul.f32 %v167_v0, %v101_v7 }
 0x139   :  { %v202_v11 = vpop.eup %201  ;;  %v115_v12 = vmul.f32 %v167_v0, %v102_v8 }
 0x13a   :  { %v204_v13 = vpop.eup %203  ;;  %157 = vst.msk [vmem:[%s296_s3] sm:$0xf] %vm156_vm1, %v175_v9  ;;  %v127_v14 = vadd.f32 %v168_v2, %v114_v10  ;;  %v103_v15 = vmul.f32 %v202_v11, %v246_v28 }
 0x13b   :  { %v128_v16 = vadd.f32 %v168_v2, %v115_v12  ;;  %v104_v17 = vmul.f32 %v204_v13, %v56_v37 }
 0x13c   :  { %v176_v18 = vpack.c.bf16 %v127_v14, %v127_v14  ;;  %v116_v19 = vmul.f32 %v167_v0, %v103_v15 }
 0x13d   :  { %v206_v21 = vpop.eup %205  ;;  %v177_v22 = vpack.c.bf16 %v128_v16, %v128_v16  ;;  %v117_v20 = vmul.f32 %v167_v0, %v104_v17 }
 0x13e   :  { %158 = vst.msk [vmem:[%s296_s3 + $0x4] sm:$0xf] %vm156_vm1, %v176_v18  ;;  %v129_v23 = vadd.f32 %v168_v2, %v116_v19  ;;  %v105_v24 = vmul.f32 %v206_v21, %v252_v38 }
 0x13f   :  { %159 = vst.msk [vmem:[%s296_s3 + $0x8] sm:$0xf] %vm156_vm1, %v177_v22  ;;  %v130_v25 = vadd.f32 %v168_v2, %v117_v20 }
 0x140   :  { %v178_v26 = vpack.c.bf16 %v129_v23, %v129_v23  ;;  %v118_v27 = vmul.f32 %v167_v0, %v105_v24 }
 0x141   :  { %v179_v28 = vpack.c.bf16 %v130_v25, %v130_v25 }
 0x142   :  { %160 = vst.msk [vmem:[%s296_s3 + $0xc] sm:$0xf] %vm156_vm1, %v178_v26  ;;  %v131_v29 = vadd.f32 %v168_v2, %v118_v27 }
 0x143   :  { %161 = vst.msk [vmem:[%s296_s3 + $0x10] sm:$0xf] %vm156_vm1, %v179_v28 }
 0x144   :  { %v180_v30 = vpack.c.bf16 %v131_v29, %v131_v29 }
 0x146   :  { %162 = vst.msk [vmem:[%s296_s3 + $0x14] sm:$0xf] %vm156_vm1, %v180_v30 }

// kernel: bert_for_multiple_choice_forward.11
= control target key start
LH: loop header
LB: loop body
LE: loop exit
PB: predicated region body
PF: predicated region fallthrough
CT: control target
= control target key end

     0   :  { %vm19_vm0 = vcmask 785408   ;;  %v259_v0 = vmov 0.0   ;;  %vm260_vm1 = vmmov 0   ;;  %vm69_vm2 = vcmask 261120   ;;  %s338_s1 = inlined_call_operand.vmem [shape: bf16[32,96], index: 1, kind: input, shape index: {}]   ;;  %s339_s0 = inlined_call_operand.vmem [shape: bf16[48,32], index: 0, kind: input, shape index: {}]   ;;  %s340_s2 = inlined_call_operand.vmem [shape: f32[1,96], index: 2, kind: input, shape index: {}]   ;;  %s341_s3 = inlined_call_operand.vmem [shape: bf16[48,96], index: 3, kind: output, shape index: {}]  }
   0x1   :  { %248 = vmatprep.subr.bf16.mxu1 %v259_v0  ;;  %v254_v1 = vld [vmem:[%s338_s1 + $0x8] sm:$0xff]   ;;  %232 = vmatprep.subr.bf16.mxu0 %v259_v0  ;;  %22 = vst.msk [vmem:[#allocation2 + $0x10] sm:$0xff] %vm19_vm0, %v259_v0  ;;  %20 = vst.msk [vmem:[#allocation2] sm:$0xff] %vm19_vm0, %v259_v0  ;;  %v255_v2 = vld [vmem:[%s338_s1] sm:$0xff]   ;;  %vm195_vm3 = vcmask 781312  }
   0x2   :  { %21 = vst.msk [vmem:[#allocation2 + $0x8] sm:$0xff] %vm19_vm0, %v259_v0  ;;  %23 = vst.msk [vmem:[#allocation2 + $0x18] sm:$0xff] %vm19_vm0, %v259_v0  ;;  %240 = vmatprep.mubr.msk.bf16.mxu1 %vm260_vm1, %v259_v0  ;;  %236 = vmatprep.mubr.msk.bf16.mxu0 %vm260_vm1, %v259_v0  ;;  %v256_v3 = vld [vmem:[%s339_s0 + $0x8] sm:$0xff]   ;;  %v257_v4 = vld [vmem:[%s339_s0] sm:$0xff]  }
   0x3   :  { %24 = vst.msk [vmem:[#allocation2 + $0x20] sm:$0xff] %vm19_vm0, %v259_v0  ;;  %25 = vst.msk [vmem:[#allocation2 + $0x28] sm:$0xff] %vm19_vm0, %v259_v0  ;;  %250 = vmatpush3.bf16.msra.mxu1 %v254_v1  ;;  %233 = vmatpush3.bf16.msra.mxu0 %v254_v1  ;;  %v258_v5 = vld [vmem:[%s339_s0 + $0x10] sm:$0xff]   ;;  %v214_v23 = vld [vmem:[%s340_s2] ss:$0 sm:$0xff] }
   0x4   :  { %249 = vmatprep.subr.bf16.mxu1 %v259_v0  ;;  %234 = vmatprep.subr.bf16.mxu0 %v259_v0 }
   0x7   :  { %251 = vmatpush3.bf16.msra.mxu1 %v255_v2  ;;  %235 = vmatpush3.bf16.msra.mxu0 %v255_v2 }
   0x8   :  { %v28_v6 = vld [vmem:[#allocation2 + $0x10] sm:$0xff]  ;;  %v26_v7 = vld [vmem:[#allocation2] sm:$0xff] }
   0x9   :  { %v29_v14 = vld [vmem:[#allocation2 + $0x18] sm:$0xff]  ;;  %v27_v15 = vld [vmem:[#allocation2 + $0x8] sm:$0xff] }
   0xa   :  { %241 = vmatmul.mubr.msk.bf16.vlgmr.msra.gmra.mxu1 %vm69_vm2, %v256_v3  ;;  %237 = vmatmul.mubr.msk.bf16.vlgmr.msra.gmra.mxu0 %vm69_vm2, %v257_v4  ;;  %v30_v22 = vld [vmem:[#allocation2 + $0x20] sm:$0xff]  ;;  %v31_v29 = vld [vmem:[#allocation2 + $0x28] sm:$0xff] }
   0xb   :  { %244 = vmatprep.mubr.msk.bf16.mxu1 %vm260_vm1, %v259_v0 }
  0x12   :  { %245 = vmatmul.mubr.msk.bf16.gmra.mxu1 %vm69_vm2, %v258_v5 }
  0xca   :  { %v121_v8 = vpop.f32.mrf.mxu1  ;;  %v113_v9 = vpop.f32.mrf.mxu0 }
  0xcb   :  { %v138_v10 = vadd.f32 %v121_v8, %v28_v6  ;;  %v136_v11 = vadd.f32 %v113_v9, %v26_v7 }
  0xcc   :  { %v242_v12 = vpop.f32.mrf.mxu1  ;;  %v238_v13 = vpop.f32.mrf.mxu0 }
  0xcd   :  { %145 = vst.msk [vmem:[#allocation2 + $0x10] sm:$0xff] %vm19_vm0, %v138_v10  ;;  %143 = vst.msk [vmem:[#allocation2] sm:$0xff] %vm19_vm0, %v136_v11 }
  0xce   :  { %v124_v16 = vpop.f32.mrf.mxu1  ;;  %v116_v17 = vpop.f32.mrf.mxu0 }
  0xcf   :  { %v139_v18 = vadd.f32 %v124_v16, %v29_v14  ;;  %v137_v19 = vadd.f32 %v116_v17, %v27_v15 }
  0xd0   :  { %v243_v20 = vpop.f32.mrf.mxu1  ;;  %v239_v21 = vpop.f32.mrf.mxu0 }
  0xd1   :  { %146 = vst.msk [vmem:[#allocation2 + $0x18] sm:$0xff] %vm19_vm0, %v139_v18  ;;  %144 = vst.msk [vmem:[#allocation2 + $0x8] sm:$0xff] %vm19_vm0, %v137_v19 }
  0xd2   :  { %v129_v24 = vpop.f32.mrf.mxu1 }
  0xd3   :  { %v140_v25 = vadd.f32 %v129_v24, %v30_v22 }
  0xd4   :  { %v154_v26 = vld [vmem:[#allocation2 + $0x10] sm:$0xff]  ;;  %v152_v27 = vld [vmem:[#allocation2] sm:$0xff]  ;;  %v246_v28 = vpop.f32.mrf.mxu1 }
  0xd5   :  { %v167_v30 = vadd.f32 %v214_v23, %v154_v26  ;;  %v165_v31 = vadd.f32 %v214_v23, %v152_v27  ;;  %147 = vst.msk [vmem:[#allocation2 + $0x20] sm:$0xff] %vm19_vm0, %v140_v25 }
  0xd6   :  { %v132_v32 = vpop.f32.mrf.mxu1 }
  0xd7   :  { %v223_v33 = vpack.c.bf16 %v167_v30, %v167_v30  ;;  %v221_v34 = vpack.c.bf16 %v165_v31, %v165_v31  ;;  %v141_v35 = vadd.f32 %v132_v32, %v31_v29 }
  0xd8   :  { %v155_v36 = vld [vmem:[#allocation2 + $0x18] sm:$0xff]  ;;  %v153_v37 = vld [vmem:[#allocation2 + $0x8] sm:$0xff]  ;;  %v247_v38 = vpop.f32.mrf.mxu1 }
  0xd9   :  { %198 = vst.msk [vmem:[%s341_s3 + $0x8] sm:$0xf] %vm195_vm3, %v223_v33  ;;  %196 = vst.msk [vmem:[%s341_s3] sm:$0xf] %vm195_vm3, %v221_v34  ;;  %v168_v39 = vadd.f32 %v214_v23, %v155_v36  ;;  %v166_v40 = vadd.f32 %v214_v23, %v153_v37 }
  0xda   :  { %148 = vst.msk [vmem:[#allocation2 + $0x28] sm:$0xff] %vm19_vm0, %v141_v35 }
  0xdb   :  { %v224_v41 = vpack.c.bf16 %v168_v39, %v168_v39  ;;  %v222_v42 = vpack.c.bf16 %v166_v40, %v166_v40 }
  0xdc   :  { %v156_v43 = vld [vmem:[#allocation2 + $0x20] sm:$0xff] }
  0xdd   :  { %199 = vst.msk [vmem:[%s341_s3 + $0xc] sm:$0xf] %vm195_vm3, %v224_v41  ;;  %197 = vst.msk [vmem:[%s341_s3 + $0x4] sm:$0xf] %vm195_vm3, %v222_v42  ;;  %v169_v44 = vadd.f32 %v214_v23, %v156_v43 }
  0xdf   :  { %v225_v45 = vpack.c.bf16 %v169_v44, %v169_v44 }
  0xe1   :  { %v157_v46 = vld [vmem:[#allocation2 + $0x28] sm:$0xff]  ;;  %200 = vst.msk [vmem:[%s341_s3 + $0x10] sm:$0xf] %vm195_vm3, %v225_v45 }
  0xe2   :  { %v170_v47 = vadd.f32 %v214_v23, %v157_v46 }
  0xe4   :  { %v226_v48 = vpack.c.bf16 %v170_v47, %v170_v47 }
  0xe6   :  { %201 = vst.msk [vmem:[%s341_s3 + $0x14] sm:$0xf] %vm195_vm3, %v226_v48 }

// kernel: bert_for_multiple_choice_forward.12
= control target key start
LH: loop header
LB: loop body
LE: loop exit
PB: predicated region body
PF: predicated region fallthrough
CT: control target
= control target key end

     0   :  { %s1037_s15 = smov 0   ;;  %s1039_s16 = smov 0   ;;  %s1142_s0 = inlined_call_operand.vmem [shape: bf16[24,8,8], index: 0, kind: input, shape index: {}]   ;;  %s1143_s1 = inlined_call_operand.vmem [shape: bf16[24,8,8], index: 1, kind: input, shape index: {}]   ;;  %s1144_s2 = inlined_call_operand.vmem [shape: bf16[24,8,8], index: 2, kind: input, shape index: {}]   ;;  %s1145_s3 = inlined_call_operand.vmem [shape: f32[6,1,8], index: 3, kind: input, shape index: {}]   ;;  %s1146_s4 = inlined_call_operand.vmem [shape: bf16[24,8,8], index: 4, kind: output, shape index: {}]  }
   0x1   :  { %s1041_s17 = smov 0  }
   0x2 LB: > { %s26_s18 = sadd.s32 1, %s1004_s16  ;;  %p860_p0 = scmp.ge.s32.totalorder %s1008_s17, 1  ;;  %s1008_s17 = sphi %s1041_s17, %s14_s17   ;;  %s1004_s16 = sphi %s1039_s16, %s1148_s16   ;;  %s1000_s15 = sphi %s1037_s15, %s1147_s15  }
   0x3   : > { %p28_p1 = scmp.ge.s32.totalorder %s26_s18, 6  ;;  %p212_p2 = scmp.lt.s32.totalorder %s1008_s17, 7 }
   0x5   : > { %s1150_s18 = smov (%p28_p1, %s26_s18), 0  ;;  %p213_p3 = pnand %p860_p0, %p212_p2 }
   0x6   : > { %s861_s19 = sshll.u32 (!%p213_p3), %s1000_s15, 2  ;;  %p278_p5 = scmp.lt.s32.totalorder (!%p213_p3), %s1000_s15, 5 }
   0x7   : > { %216 = sbr.rel (%p213_p3) target bundleno = 742 (0x2e6), region = 36  ;;  %p258_p4 = scmp.lt.s32.totalorder (!%p213_p3), %s861_s19, 23 }
   0xc   : > { %v1010_v0 = vmov 0.0   ;;  %vm1011_vm0 = vmmov 0   ;;  %s1152_s19 = smov (!%p258_p4, %s861_s19), 23  ;;  %vm307_vm1 = vcmask 1043456   ;;  %vm303_vm2 = vcmask 64512   ;;  %s1154_s15 = smov (!%p278_p5, %s1000_s15), 5 }
   0xd   : > { %896 = vmatprep.subr.bf16.mxu0 %v1010_v0  ;;  %902 = vmatprep.subr.bf16.mxu1 %v1010_v0  ;;  %s1064_s20 = sshll.u32 %s1152_s19, 2  ;;  %s280_s29 = scalar_lea.vmem %s1145_s3, %s1154_s15  ;;  %vm740_vm3 = vcmask 60416  }
   0xe   : > { %898 = vmatprep.mubr.msk.bf16.mxu0 %vm1011_vm0, %v1010_v0  ;;  %904 = vmatprep.mubr.msk.bf16.mxu1 %vm1011_vm0, %v1010_v0  ;;  %s270_s23 = scalar_lea.vmem %s1143_s1, %s1064_s20  ;;  %s264_s26 = scalar_lea.vmem %s1142_s0, %s1064_s20  ;;  %v873_v15 = vld [vmem:[%s280_s29] ss:$0 sm:$0xff] }
   0xf   : > { %v295_v1 = vld [vmem:[%s270_s23] sm:$0xf]  ;;  %v296_v2 = vld [vmem:[%s270_s23 + $0x4] sm:$0xf]  ;;  %v297_v5 = vld [vmem:[%s270_s23 + $0x8] sm:$0xf]  ;;  %s276_s6 = scalar_lea.vmem %s1144_s2, %s1064_s20  ;;  %s288_s9 = scalar_lea.vmem %s1146_s4, %s1064_s20 }
  0x10   : > { %v309_v3 = vsel %vm307_vm1, %v295_v1, 0  ;;  %v355_v4 = vsel %vm307_vm1, %v296_v2, 0  ;;  %v291_v6 = vld [vmem:[%s264_s26] sm:$0xf]  ;;  %v292_v7 = vld [vmem:[%s264_s26 + $0x4] sm:$0xf] }
  0x11   : > { %897 = vmatpush3.bf16.msra.mxu0 %v309_v3  ;;  %903 = vmatpush3.bf16.msra.mxu1 %v355_v4  ;;  %v298_v8 = vld [vmem:[%s270_s23 + $0xc] sm:$0xf]  ;;  %v401_v9 = vsel %vm307_vm1, %v297_v5, 0  ;;  %v293_v11 = vld [vmem:[%s264_s26 + $0x8] sm:$0xf] }
  0x12   : > { %908 = vmatprep.subr.bf16.mxu0 %v1010_v0  ;;  %914 = vmatprep.subr.bf16.mxu1 %v1010_v0  ;;  %v447_v10 = vsel %vm307_vm1, %v298_v8, 0  ;;  %v294_v12 = vld [vmem:[%s264_s26 + $0xc] sm:$0xf]  ;;  %v299_v62 = vld [vmem:[%s276_s6] sm:$0xf] }
  0x13   : > { %v300_v63 = vld [vmem:[%s276_s6 + $0x4] sm:$0xf]  ;;  %v556_v1 = vsel %vm307_vm1, %v299_v62, 0  ;;  %v301_v8 = vld [vmem:[%s276_s6 + $0x8] sm:$0xf] }
  0x14   : > { %899 = vmatmul.mubr.msk.bf16.vlgmr.msra.gmra.mxu0 %vm303_vm2, %v291_v6  ;;  %905 = vmatmul.mubr.msk.bf16.vlgmr.msra.gmra.mxu1 %vm303_vm2, %v292_v7  ;;  %v602_v2 = vsel %vm307_vm1, %v300_v63, 0 }
  0x15   : > { %909 = vmatpush3.bf16.msra.mxu0 %v401_v9  ;;  %915 = vmatpush3.bf16.msra.mxu1 %v447_v10 }
  0x16   : > { %910 = vmatprep.mubr.msk.bf16.mxu0 %vm1011_vm0, %v1010_v0  ;;  %916 = vmatprep.mubr.msk.bf16.mxu1 %vm1011_vm0, %v1010_v0 }
  0x17   : > { %920 = vmatprep.subr.bf16.mxu0 %v1010_v0  ;;  %926 = vmatprep.subr.bf16.mxu1 %v1010_v0 }
  0x1c   : > { %911 = vmatmul.mubr.msk.bf16.vlgmr.msra.gmra.mxu0 %vm303_vm2, %v293_v11  ;;  %917 = vmatmul.mubr.msk.bf16.vlgmr.msra.gmra.mxu1 %vm303_vm2, %v294_v12  ;;  %v648_v11 = vsel %vm307_vm1, %v301_v8, 0 }
  0x1d   : > { %922 = vmatprep.mubr.msk.bf16.mxu0 %vm1011_vm0, %v1010_v0  ;;  %928 = vmatprep.mubr.msk.bf16.mxu1 %vm1011_vm0, %v1010_v0 }
  0x1e   : > { %921 = vmatpush3.bf16.msra.mxu0 %v556_v1  ;;  %927 = vmatpush3.bf16.msra.mxu1 %v602_v2 }
  0x1f   : > { %932 = vmatprep.subr.bf16.mxu0 %v1010_v0  ;;  %938 = vmatprep.subr.bf16.mxu1 %v1010_v0 }
  0xd4   : > { %v345_v13 = vpop.f32.mrf.mxu0  ;;  %v391_v14 = vpop.f32.mrf.mxu1 }
  0xd5   : > { %v489_v16 = vmul.f32 0.35355338, %v345_v13  ;;  %v490_v17 = vmul.f32 0.35355338, %v391_v14  ;;  %v302_v13 = vld [vmem:[%s276_s6 + $0xc] sm:$0xf] }
  0xd6   : > { %v900_v18 = vpop.f32.mrf.mxu0  ;;  %v906_v19 = vpop.f32.mrf.mxu1 }
  0xd7   : > { %v500_v20 = vadd.f32 %v873_v15, %v489_v16  ;;  %v501_v21 = vadd.f32 %v873_v15, %v490_v17  ;;  %v694_v16 = vsel %vm307_vm1, %v302_v13, 0 }
  0xd8   : > { %v348_v22 = vpop.f32.mrf.mxu0  ;;  %v394_v23 = vpop.f32.mrf.mxu1 }
  0xd9   : > { %v504_v24 = vsel %vm303_vm2, %v500_v20, -inf  ;;  %v507_v27 = vsel %vm303_vm2, %v501_v21, -inf }
  0xda   : > { %v907_v25 = vpop.f32.mrf.mxu1  ;;  %505 = vmax.xlane.f32.xlu0 %v504_v24  ;;  %v901_v26 = vpop.f32.mrf.mxu0 }
  0xdc   : > { %v437_v28 = vpop.f32.mrf.mxu0  ;;  %v483_v29 = vpop.f32.mrf.mxu1 }
  0xdd   : > { %v491_v30 = vmul.f32 0.35355338, %v437_v28  ;;  %v492_v31 = vmul.f32 0.35355338, %v483_v29 }
  0xde   : > { %v918_v32 = vpop.f32.mrf.mxu1  ;;  %508 = vmax.xlane.f32.xlu0 %v507_v27  ;;  %v912_v33 = vpop.f32.mrf.mxu0 }
  0xdf   : > { %v502_v34 = vadd.f32 %v873_v15, %v491_v30  ;;  %v503_v35 = vadd.f32 %v873_v15, %v492_v31 }
  0xe0   : > { %v440_v36 = vpop.f32.mrf.mxu0  ;;  %v486_v37 = vpop.f32.mrf.mxu1 }
  0xe1   : > { %v510_v38 = vsel %vm303_vm2, %v502_v34, -inf  ;;  %v513_v41 = vsel %vm303_vm2, %v503_v35, -inf }
  0xe2   : > { %v919_v39 = vpop.f32.mrf.mxu1  ;;  %511 = vmax.xlane.f32.xlu1 %v510_v38  ;;  %v913_v40 = vpop.f32.mrf.mxu0 }
  0xe6   : > { %514 = vmax.xlane.f32.xlu1 %v513_v41 }
 0x163   : > { %v506_v42 = vpop.xlane.xlu0 %505 }
 0x164   : > { %v516_v43 = vsub.f32 %v500_v20, %v506_v42 }
 0x166   : > { %v520_v44 = vmul.f32 1.442695, %v516_v43 }
 0x167   : > { %v509_v45 = vpop.xlane.xlu0 %508 }
 0x168   : > { %970 = vpow2.f32 %v520_v44  ;;  %v517_v46 = vsub.f32 %v501_v21, %v509_v45 }
 0x16a   : > { %v522_v47 = vmul.f32 1.442695, %v517_v46 }
 0x16b   : > { %v512_v48 = vpop.xlane.xlu1 %511 }
 0x16c   : > { %972 = vpow2.f32 %v522_v47  ;;  %v518_v49 = vsub.f32 %v502_v34, %v512_v48 }
 0x16e   : > { %v524_v50 = vmul.f32 1.442695, %v518_v49 }
 0x16f   : > { %v515_v51 = vpop.xlane.xlu1 %514 }
 0x170   : > { %974 = vpow2.f32 %v524_v50  ;;  %v519_v52 = vsub.f32 %v503_v35, %v515_v51 }
 0x172   : > { %v526_v53 = vmul.f32 1.442695, %v519_v52 }
 0x174   : > { %976 = vpow2.f32 %v526_v53 }
 0x175   : > { %v971_v54 = vpop.eup %970 }
 0x176   : > { %v528_v55 = vsel %vm303_vm2, %v971_v54, 0.0 }
 0x177   : > { %529 = vadd.xlane.f32.xlu0 %v528_v55 }
 0x179   : > { %v973_v56 = vpop.eup %972 }
 0x17a   : > { %v531_v57 = vsel %vm303_vm2, %v973_v56, 0.0 }
 0x17b   : > { %532 = vadd.xlane.f32.xlu1 %v531_v57 }
 0x17d   : > { %v975_v58 = vpop.eup %974 }
 0x17e   : > { %v534_v59 = vsel %vm303_vm2, %v975_v58, 0.0 }
 0x17f   : > { %535 = vadd.xlane.f32.xlu0 %v534_v59 }
 0x181   : > { %v977_v60 = vpop.eup %976 }
 0x182   : > { %v537_v61 = vsel %vm303_vm2, %v977_v60, 0.0 }
 0x183   : > { %538 = vadd.xlane.f32.xlu1 %v537_v61 }
 0x200   : > { %v530_v3 = vpop.xlane.xlu0 %529 }
 0x201   : > { %978 = vrcp.f32 %v530_v3 }
 0x204   : > { %v533_v4 = vpop.xlane.xlu1 %532 }
 0x205   : > { %980 = vrcp.f32 %v533_v4 }
 0x208   : > { %v536_v5 = vpop.xlane.xlu0 %535 }
 0x209   : > { %982 = vrcp.f32 %v536_v5 }
 0x20c   : > { %v539_v6 = vpop.xlane.xlu1 %538 }
 0x20d   : > { %984 = vrcp.f32 %v539_v6 }
 0x20e   : > { %v979_v7 = vpop.eup %978 }
 0x20f   : > { %v544_v9 = vmul.f32 %v979_v7, %v971_v54 }
 0x211   : > { %v548_v10 = vpack.c.bf16 %v544_v9, %v544_v9 }
 0x212   : > { %v981_v12 = vpop.eup %980 }
 0x213   : > { %923 = vmatmul.mubr.msk.bf16.vlgmr.msra.gmra.mxu0 %vm303_vm2, %v548_v10  ;;  %v545_v14 = vmul.f32 %v981_v12, %v973_v56 }
 0x214   : > { %933 = vmatpush3.bf16.msra.mxu0 %v648_v11  ;;  %934 = vmatprep.mubr.msk.bf16.mxu0 %vm1011_vm0, %v1010_v0 }
 0x215   : > { %v549_v15 = vpack.c.bf16 %v545_v14, %v545_v14 }
 0x216   : > { %v983_v17 = vpop.eup %982 }
 0x217   : > { %929 = vmatmul.mubr.msk.bf16.vlgmr.msra.gmra.mxu1 %vm303_vm2, %v549_v15  ;;  %v546_v18 = vmul.f32 %v983_v17, %v975_v58 }
 0x218   : > { %939 = vmatpush3.bf16.msra.mxu1 %v694_v16  ;;  %940 = vmatprep.mubr.msk.bf16.mxu1 %vm1011_vm0, %v1010_v0 }
 0x219   : > { %v550_v19 = vpack.c.bf16 %v546_v18, %v546_v18 }
 0x21a   : > { %v985_v20 = vpop.eup %984 }
 0x21b   : > { %935 = vmatmul.mubr.msk.bf16.vlgmr.msra.gmra.mxu0 %vm303_vm2, %v550_v19  ;;  %v547_v21 = vmul.f32 %v985_v20, %v977_v60 }
 0x21d   : > { %v551_v22 = vpack.c.bf16 %v547_v21, %v547_v21 }
 0x21f   : > { %941 = vmatmul.mubr.msk.bf16.vlgmr.msra.gmra.mxu1 %vm303_vm2, %v551_v22 }
 0x2d3   : > { %v592_v23 = vpop.f32.mrf.mxu0 }
 0x2d4   : > { %v736_v24 = vpack.c.bf16 %v592_v23, %v592_v23 }
 0x2d5   : > { %v924_v25 = vpop.f32.mrf.mxu0 }
 0x2d6   : > { %741 = vst.msk [vmem:[%s288_s9] sm:$0xf] %vm740_vm3, %v736_v24 }
 0x2d7   : > { %v595_v26 = vpop.f32.mrf.mxu0  ;;  %v638_v0 = vpop.f32.mrf.mxu1 }
 0x2d8   : > { %v737_v27 = vpack.c.bf16 %v638_v0, %v638_v0 }
 0x2d9   : > { %v925_v28 = vpop.f32.mrf.mxu0  ;;  %v930_v29 = vpop.f32.mrf.mxu1 }
 0x2da   : > { %742 = vst.msk [vmem:[%s288_s9 + $0x4] sm:$0xf] %vm740_vm3, %v737_v27 }
 0x2db   : > { %v641_v30 = vpop.f32.mrf.mxu1  ;;  %v684_v31 = vpop.f32.mrf.mxu0 }
 0x2dc   : > { %v738_v32 = vpack.c.bf16 %v684_v31, %v684_v31 }
 0x2dd   : > { %v931_v33 = vpop.f32.mrf.mxu1  ;;  %v936_v34 = vpop.f32.mrf.mxu0 }
 0x2de   : > { %743 = vst.msk [vmem:[%s288_s9 + $0x8] sm:$0xf] %vm740_vm3, %v738_v32 }
 0x2df   : > { %v687_v35 = vpop.f32.mrf.mxu0  ;;  %v730_v36 = vpop.f32.mrf.mxu1 }
 0x2e0   : > { %v739_v37 = vpack.c.bf16 %v730_v36, %v730_v36 }
 0x2e1   : > { %v937_v38 = vpop.f32.mrf.mxu0  ;;  %v942_v39 = vpop.f32.mrf.mxu1 }
 0x2e2   : > { %744 = vst.msk [vmem:[%s288_s9 + $0xc] sm:$0xf] %vm740_vm3, %v739_v37 }
 0x2e3   : > { %v733_v40 = vpop.f32.mrf.mxu1 }
 0x2e5   : > { %v943_v41 = vpop.f32.mrf.mxu1 }
 0x2e6 PF: > { %s14_s17 = sadd.s32 1, %s1008_s17   ;;  %s1147_s15 = smov %s1004_s16 }
 0x2e7   : > { %p11_p6 = scmp.ge.s32.totalorder %s14_s17, 8   ;;  %s1148_s16 = smov %s1150_s18 }
 0x2e9   :  { %13 = sbr.rel (!%p11_p6) target bundleno = 2 (0x2), region = 75 }

// kernel: bert_for_multiple_choice_forward.13
= control target key start
LH: loop header
LB: loop body
LE: loop exit
PB: predicated region body
PF: predicated region fallthrough
CT: control target
= control target key end

     0   :  { %vm28_vm0 = vcmask 261120   ;;  %v418_v0 = vmov 0.0   ;;  %vm419_vm1 = vmmov 0   ;;  %vm326_vm2 = vcmask 257024   ;;  %s559_s1 = inlined_call_operand.vmem [shape: bf16[32,32], index: 1, kind: input, shape index: {}]   ;;  %s560_s0 = inlined_call_operand.vmem [shape: bf16[48,32], index: 0, kind: input, shape index: {}]   ;;  %s561_s3 = inlined_call_operand.vmem [shape: bf16[48,32], index: 3, kind: input, shape index: {}]   ;;  %s562_s2 = inlined_call_operand.vmem [shape: f32[1,32], index: 2, kind: input, shape index: {}]   ;;  %s563_s4 = inlined_call_operand.vmem [shape: f32[1,32], index: 4, kind: input, shape index: {}]   ;;  %s564_s5 = inlined_call_operand.vmem [shape: f32[1,32], index: 5, kind: input, shape index: {}]   ;;  %s565_s6 = inlined_call_operand.vmem [shape: bf16[48,32], index: 6, kind: output, shape index: {}]  }
   0x1   :  { %379 = vmatprep.subr.bf16.mxu0 %v418_v0  ;;  %395 = vmatprep.subr.bf16.mxu1 %v418_v0  ;;  %v401_v1 = vld [vmem:[%s559_s1 + $0x8] sm:$0xff]   ;;  %29 = vst.msk [vmem:[#allocation2] sm:$0xff] %vm28_vm0, %v418_v0  ;;  %30 = vst.msk [vmem:[#allocation2 + $0x8] sm:$0xff] %vm28_vm0, %v418_v0  ;;  %v402_v2 = vld [vmem:[%s559_s1] sm:$0xff]  }
   0x2   :  { %31 = vst.msk [vmem:[#allocation2 + $0x10] sm:$0xff] %vm28_vm0, %v418_v0  ;;  %32 = vst.msk [vmem:[#allocation2 + $0x18] sm:$0xff] %vm28_vm0, %v418_v0  ;;  %383 = vmatprep.mubr.msk.bf16.mxu0 %vm419_vm1, %v418_v0  ;;  %387 = vmatprep.mubr.msk.bf16.mxu1 %vm419_vm1, %v418_v0  ;;  %v403_v3 = vld [vmem:[%s560_s0] sm:$0xff]   ;;  %v404_v4 = vld [vmem:[%s560_s0 + $0x8] sm:$0xff]  }
   0x3   :  { %33 = vst.msk [vmem:[#allocation2 + $0x20] sm:$0xff] %vm28_vm0, %v418_v0  ;;  %34 = vst.msk [vmem:[#allocation2 + $0x28] sm:$0xff] %vm28_vm0, %v418_v0  ;;  %380 = vmatpush3.bf16.msra.mxu0 %v401_v1  ;;  %397 = vmatpush3.bf16.msra.mxu1 %v401_v1  ;;  %v405_v5 = vld [vmem:[%s560_s0 + $0x10] sm:$0xff]   ;;  %v372_v23 = vld [vmem:[%s561_s3 + $0x8] sm:$0xff]  }
   0x4   :  { %381 = vmatprep.subr.bf16.mxu0 %v418_v0  ;;  %396 = vmatprep.subr.bf16.mxu1 %v418_v0  ;;  %v361_v24 = vld [vmem:[%s561_s3] sm:$0xff]   ;;  %v366_v28 = vunpack.c.l.bf16 %v372_v23  ;;  %v367_v37 = vunpack.c.h.bf16 %v372_v23  ;;  %v373_v45 = vld [vmem:[%s561_s3 + $0x10] sm:$0xff]  }
   0x5   :  { %v345_v26 = vld [vmem:[%s562_s2] ss:$0 sm:$0xff]  ;;  %v362_v29 = vunpack.c.l.bf16 %v361_v24  ;;  %v363_v41 = vunpack.c.h.bf16 %v361_v24  ;;  %v370_v52 = vunpack.c.l.bf16 %v373_v45  ;;  %v371_v58 = vunpack.c.h.bf16 %v373_v45 }
   0x7   :  { %382 = vmatpush3.bf16.msra.mxu0 %v402_v2  ;;  %398 = vmatpush3.bf16.msra.mxu1 %v402_v2 }
   0x8   :  { %v35_v6 = vld [vmem:[#allocation2] sm:$0xff]  ;;  %v36_v14 = vld [vmem:[#allocation2 + $0x8] sm:$0xff] }
   0x9   :  { %v37_v7 = vld [vmem:[#allocation2 + $0x10] sm:$0xff]  ;;  %v38_v15 = vld [vmem:[#allocation2 + $0x18] sm:$0xff] }
   0xa   :  { %384 = vmatmul.mubr.msk.bf16.vlgmr.msra.gmra.mxu0 %vm28_vm0, %v403_v3  ;;  %388 = vmatmul.mubr.msk.bf16.vlgmr.msra.gmra.mxu1 %vm28_vm0, %v404_v4  ;;  %v39_v22 = vld [vmem:[#allocation2 + $0x20] sm:$0xff]  ;;  %v40_v31 = vld [vmem:[#allocation2 + $0x28] sm:$0xff] }
   0xb   :  { %391 = vmatprep.mubr.msk.bf16.mxu1 %vm419_vm1, %v418_v0 }
  0x12   :  { %392 = vmatmul.mubr.msk.bf16.gmra.mxu1 %vm28_vm0, %v405_v5 }
  0xca   :  { %v122_v8 = vpop.f32.mrf.mxu0  ;;  %v130_v9 = vpop.f32.mrf.mxu1 }
  0xcb   :  { %v145_v10 = vadd.f32 %v122_v8, %v35_v6  ;;  %v147_v11 = vadd.f32 %v130_v9, %v37_v7 }
  0xcc   :  { %v385_v12 = vpop.f32.mrf.mxu0  ;;  %v389_v13 = vpop.f32.mrf.mxu1 }
  0xcd   :  { %151 = vst.msk [vmem:[#allocation2] sm:$0xff] %vm28_vm0, %v145_v10  ;;  %153 = vst.msk [vmem:[#allocation2 + $0x10] sm:$0xff] %vm28_vm0, %v147_v11 }
  0xce   :  { %v125_v16 = vpop.f32.mrf.mxu0  ;;  %v133_v17 = vpop.f32.mrf.mxu1 }
  0xcf   :  { %v146_v18 = vadd.f32 %v125_v16, %v36_v14  ;;  %v148_v19 = vadd.f32 %v133_v17, %v38_v15 }
  0xd0   :  { %v386_v20 = vpop.f32.mrf.mxu0  ;;  %v390_v21 = vpop.f32.mrf.mxu1 }
  0xd1   :  { %152 = vst.msk [vmem:[#allocation2 + $0x8] sm:$0xff] %vm28_vm0, %v146_v18  ;;  %154 = vst.msk [vmem:[#allocation2 + $0x18] sm:$0xff] %vm28_vm0, %v148_v19 }
  0xd2   :  { %v138_v25 = vpop.f32.mrf.mxu1 }
  0xd3   :  { %v149_v27 = vadd.f32 %v138_v25, %v39_v22 }
  0xd4   :  { %v393_v30 = vpop.f32.mrf.mxu1  ;;  %v162_v32 = vld [vmem:[#allocation2 + $0x10] sm:$0xff]  ;;  %v160_v33 = vld [vmem:[#allocation2] sm:$0xff] }
  0xd5   :  { %155 = vst.msk [vmem:[#allocation2 + $0x20] sm:$0xff] %vm28_vm0, %v149_v27  ;;  %v175_v34 = vadd.f32 %v345_v26, %v162_v32  ;;  %v173_v35 = vadd.f32 %v345_v26, %v160_v33 }
  0xd6   :  { %v141_v36 = vpop.f32.mrf.mxu1 }
  0xd7   :  { %v150_v38 = vadd.f32 %v141_v36, %v40_v31  ;;  %v193_v39 = vadd.f32 %v366_v28, %v175_v34  ;;  %v191_v40 = vadd.f32 %v362_v29, %v173_v35 }
  0xd8   :  { %v394_v42 = vpop.f32.mrf.mxu1  ;;  %v163_v43 = vld [vmem:[#allocation2 + $0x18] sm:$0xff]  ;;  %v161_v44 = vld [vmem:[#allocation2 + $0x8] sm:$0xff] }
  0xd9   :  { %156 = vst.msk [vmem:[#allocation2 + $0x28] sm:$0xff] %vm28_vm0, %v150_v38  ;;  %v203_v46 = vsel %vm28_vm0, %v193_v39, 0.0  ;;  %v197_v47 = vsel %vm28_vm0, %v191_v40, 0.0  ;;  %v176_v48 = vadd.f32 %v345_v26, %v163_v43  ;;  %v174_v49 = vadd.f32 %v345_v26, %v161_v44 }
  0xda   :  { %204 = vadd.xlane.f32.xlu1 %v203_v46  ;;  %198 = vadd.xlane.f32.xlu0 %v197_v47 }
  0xdb   :  { %v194_v50 = vadd.f32 %v367_v37, %v176_v48  ;;  %v192_v51 = vadd.f32 %v363_v41, %v174_v49  ;;  %v346_v49 = vld [vmem:[%s563_s4] ss:$0 sm:$0xff] }
  0xdc   :  { %v164_v53 = vld [vmem:[#allocation2 + $0x20] sm:$0xff] }
  0xdd   :  { %v206_v54 = vsel %vm28_vm0, %v194_v50, 0.0  ;;  %v200_v55 = vsel %vm28_vm0, %v192_v51, 0.0  ;;  %v177_v56 = vadd.f32 %v345_v26, %v164_v53 }
  0xde   :  { %207 = vadd.xlane.f32.xlu1 %v206_v54  ;;  %201 = vadd.xlane.f32.xlu0 %v200_v55 }
  0xdf   :  { %v195_v57 = vadd.f32 %v370_v52, %v177_v56 }
  0xe0   :  { %v165_v59 = vld [vmem:[#allocation2 + $0x28] sm:$0xff] }
  0xe1   :  { %v209_v60 = vsel %vm28_vm0, %v195_v57, 0.0  ;;  %v178_v61 = vadd.f32 %v345_v26, %v165_v59 }
  0xe2   :  { %210 = vadd.xlane.f32.xlu0 %v209_v60 }
  0xe3   :  { %v196_v62 = vadd.f32 %v371_v58, %v178_v61 }
  0xe5   :  { %v212_v63 = vsel %vm28_vm0, %v196_v62, 0.0 }
  0xe6   :  { %213 = vadd.xlane.f32.xlu1 %v212_v63 }
 0x163   :  { %v205_v0 = vpop.xlane.xlu1 %204  ;;  %v199_v1 = vpop.xlane.xlu0 %198 }
 0x164   :  { %v218_v2 = vmul.f32 0.03125, %v205_v0  ;;  %v216_v3 = vmul.f32 0.03125, %v199_v1 }
 0x166   :  { %v503_v4 = vsub.f32 %v193_v39, %v218_v2  ;;  %v222_v5 = vsub.f32 %v191_v40, %v216_v3 }
 0x167   :  { %v208_v6 = vpop.xlane.xlu1 %207  ;;  %v202_v7 = vpop.xlane.xlu0 %201 }
 0x168   :  { %v219_v8 = vmul.f32 0.03125, %v208_v6  ;;  %v217_v9 = vmul.f32 0.03125, %v202_v7  ;;  %v228_v10 = vmul.f32 %v222_v5, %v222_v5  ;;  %v230_v14 = vmul.f32 %v503_v4, %v503_v4 }
 0x16a   :  { %v505_v11 = vsub.f32 %v194_v50, %v219_v8  ;;  %v223_v12 = vsub.f32 %v192_v51, %v217_v9  ;;  %v234_v13 = vsel %vm28_vm0, %v228_v10, 0.0  ;;  %v240_v19 = vsel %vm28_vm0, %v230_v14, 0.0  ;;  %v347_v51 = vld [vmem:[%s564_s5] ss:$0 sm:$0xff] }
 0x16b   :  { %235 = vadd.xlane.f32.xlu0 %v234_v13  ;;  %v211_v15 = vpop.xlane.xlu0 %210 }
 0x16c   :  { %v220_v16 = vmul.f32 0.03125, %v211_v15  ;;  %v229_v17 = vmul.f32 %v223_v12, %v223_v12  ;;  %v231_v21 = vmul.f32 %v505_v11, %v505_v11 }
 0x16e   :  { %v510_v18 = vsub.f32 %v195_v57, %v220_v16  ;;  %v237_v20 = vsel %vm28_vm0, %v229_v17, 0.0  ;;  %v243_v26 = vsel %vm28_vm0, %v231_v21, 0.0 }
 0x16f   :  { %v214_v22 = vpop.xlane.xlu1 %213  ;;  %241 = vadd.xlane.f32.xlu0 %v240_v19  ;;  %238 = vadd.xlane.f32.xlu1 %v237_v20 }
 0x170   :  { %v221_v23 = vmul.f32 0.03125, %v214_v22  ;;  %v232_v24 = vmul.f32 %v510_v18, %v510_v18 }
 0x172   :  { %v518_v25 = vsub.f32 %v196_v62, %v221_v23  ;;  %v246_v27 = vsel %vm28_vm0, %v232_v24, 0.0 }
 0x173   :  { %244 = vadd.xlane.f32.xlu1 %v243_v26  ;;  %247 = vadd.xlane.f32.xlu0 %v246_v27 }
 0x174   :  { %v233_v28 = vmul.f32 %v518_v25, %v518_v25 }
 0x176   :  { %v249_v29 = vsel %vm28_vm0, %v233_v28, 0.0 }
 0x177   :  { %250 = vadd.xlane.f32.xlu1 %v249_v29 }
 0x1f4   :  { %v236_v30 = vpop.xlane.xlu0 %235 }
 0x1f5   :  { %v252_v31 = vmul.f32 0.03125, %v236_v30 }
 0x1f7   :  { %v258_v32 = vadd.f32 1e-12, %v252_v31 }
 0x1f8   :  { %v239_v33 = vpop.xlane.xlu1 %238  ;;  %v242_v34 = vpop.xlane.xlu0 %241 }
 0x1f9   :  { %406 = vrsqrt.f32 %v258_v32  ;;  %v253_v35 = vmul.f32 0.03125, %v239_v33  ;;  %v254_v36 = vmul.f32 0.03125, %v242_v34 }
 0x1fb   :  { %v259_v37 = vadd.f32 1e-12, %v253_v35  ;;  %v260_v38 = vadd.f32 1e-12, %v254_v36 }
 0x1fc   :  { %v245_v39 = vpop.xlane.xlu1 %244  ;;  %v248_v40 = vpop.xlane.xlu0 %247 }
 0x1fd   :  { %408 = vrsqrt.f32 %v259_v37  ;;  %v255_v41 = vmul.f32 0.03125, %v245_v39  ;;  %v256_v42 = vmul.f32 0.03125, %v248_v40 }
 0x1fe   :  { %410 = vrsqrt.f32 %v260_v38 }
 0x1ff   :  { %v261_v43 = vadd.f32 1e-12, %v255_v41  ;;  %v262_v44 = vadd.f32 1e-12, %v256_v42 }
 0x200   :  { %v251_v45 = vpop.xlane.xlu1 %250 }
 0x201   :  { %412 = vrsqrt.f32 %v261_v43  ;;  %v257_v46 = vmul.f32 0.03125, %v251_v45 }
 0x202   :  { %414 = vrsqrt.f32 %v262_v44 }
 0x203   :  { %v263_v47 = vadd.f32 1e-12, %v257_v46 }
 0x205   :  { %416 = vrsqrt.f32 %v263_v47 }
 0x206   :  { %v407_v48 = vpop.eup %406 }
 0x207   :  { %v270_v50 = vmul.f32 %v407_v48, %v222_v5 }
 0x209   :  { %v283_v52 = vmul.f32 %v346_v49, %v270_v50 }
 0x20a   :  { %v409_v53 = vpop.eup %408 }
 0x20b   :  { %v411_v54 = vpop.eup %410  ;;  %v296_v55 = vadd.f32 %v347_v51, %v283_v52  ;;  %v271_v56 = vmul.f32 %v409_v53, %v223_v12 }
 0x20c   :  { %v272_v57 = vmul.f32 %v411_v54, %v503_v4 }
 0x20d   :  { %v354_v58 = vpack.c.bf16 %v296_v55, %v296_v55  ;;  %v284_v59 = vmul.f32 %v346_v49, %v271_v56 }
 0x20e   :  { %v413_v60 = vpop.eup %412  ;;  %v285_v61 = vmul.f32 %v346_v49, %v272_v57 }
 0x20f   :  { %v415_v62 = vpop.eup %414  ;;  %327 = vst.msk [vmem:[%s565_s6] sm:$0xf] %vm326_vm2, %v354_v58  ;;  %v297_v63 = vadd.f32 %v347_v51, %v284_v59  ;;  %v273_v0 = vmul.f32 %v413_v60, %v505_v11 }
 0x210   :  { %v298_v1 = vadd.f32 %v347_v51, %v285_v61  ;;  %v274_v2 = vmul.f32 %v415_v62, %v510_v18 }
 0x211   :  { %v355_v3 = vpack.c.bf16 %v297_v63, %v297_v63  ;;  %v286_v5 = vmul.f32 %v346_v49, %v273_v0 }
 0x212   :  { %v417_v6 = vpop.eup %416  ;;  %v356_v4 = vpack.c.bf16 %v298_v1, %v298_v1  ;;  %v287_v7 = vmul.f32 %v346_v49, %v274_v2 }
 0x213   :  { %328 = vst.msk [vmem:[%s565_s6 + $0x4] sm:$0xf] %vm326_vm2, %v355_v3  ;;  %v299_v8 = vadd.f32 %v347_v51, %v286_v5  ;;  %v275_v9 = vmul.f32 %v417_v6, %v518_v25 }
 0x214   :  { %329 = vst.msk [vmem:[%s565_s6 + $0x8] sm:$0xf] %vm326_vm2, %v356_v4  ;;  %v300_v10 = vadd.f32 %v347_v51, %v287_v7 }
 0x215   :  { %v357_v11 = vpack.c.bf16 %v299_v8, %v299_v8  ;;  %v288_v12 = vmul.f32 %v346_v49, %v275_v9 }
 0x216   :  { %v358_v13 = vpack.c.bf16 %v300_v10, %v300_v10 }
 0x217   :  { %330 = vst.msk [vmem:[%s565_s6 + $0xc] sm:$0xf] %vm326_vm2, %v357_v11  ;;  %v301_v14 = vadd.f32 %v347_v51, %v288_v12 }
 0x218   :  { %331 = vst.msk [vmem:[%s565_s6 + $0x10] sm:$0xf] %vm326_vm2, %v358_v13 }
 0x219   :  { %v359_v15 = vpack.c.bf16 %v301_v14, %v301_v14 }
 0x21b   :  { %332 = vst.msk [vmem:[%s565_s6 + $0x14] sm:$0xf] %vm326_vm2, %v359_v15 }

// kernel: bert_for_multiple_choice_forward.14
= control target key start
LH: loop header
LB: loop body
LE: loop exit
PB: predicated region body
PF: predicated region fallthrough
CT: control target
= control target key end

     0   :  { %vm31_vm0 = vcmask 261120   ;;  %v631_v0 = vmov 0.0   ;;  %vm632_vm1 = vmmov 0   ;;  %vm244_vm2 = vcmask 523264   ;;  %s819_s1 = inlined_call_operand.vmem [shape: bf16[32,64], index: 1, kind: input, shape index: {}]   ;;  %s820_s0 = inlined_call_operand.vmem [shape: bf16[48,32], index: 0, kind: input, shape index: {}]   ;;  %s821_s3 = inlined_call_operand.vmem [shape: bf16[64,32], index: 3, kind: input, shape index: {}]   ;;  %s822_s2 = inlined_call_operand.vmem [shape: f32[1,64], index: 2, kind: input, shape index: {}]   ;;  %s823_s4 = inlined_call_operand.vmem [shape: f32[1,32], index: 4, kind: input, shape index: {}]   ;;  %s824_s5 = inlined_call_operand.vmem [shape: f32[1,32], index: 5, kind: input, shape index: {}]   ;;  %s825_s6 = inlined_call_operand.vmem [shape: f32[1,32], index: 6, kind: input, shape index: {}]   ;;  %s826_s7 = inlined_call_operand.vmem [shape: bf16[48,32], index: 7, kind: output, shape index: {}]  }
   0x1   :  { %560 = vmatprep.subr.bf16.mxu0 %v631_v0  ;;  %v598_v1 = vld [vmem:[%s819_s1 + $0x8] sm:$0xff]   ;;  %564 = vmatprep.mubr.msk.bf16.mxu0 %vm632_vm1, %v631_v0  ;;  %32 = vst.msk [vmem:[#allocation2] sm:$0xff] %vm31_vm0, %v631_v0  ;;  %33 = vst.msk [vmem:[#allocation2 + $0x8] sm:$0xff] %vm31_vm0, %v631_v0  ;;  %v599_v2 = vld [vmem:[%s819_s1] sm:$0xff]   ;;  %vm492_vm3 = vcmask 257024  }
   0x2   :  { %34 = vst.msk [vmem:[#allocation2 + $0x10] sm:$0xff] %vm31_vm0, %v631_v0  ;;  %35 = vst.msk [vmem:[#allocation2 + $0x18] sm:$0xff] %vm31_vm0, %v631_v0  ;;  %576 = vmatprep.subr.bf16.mxu1 %v631_v0  ;;  %584 = vmatprep.mubr.msk.bf16.mxu1 %vm632_vm1, %v631_v0  ;;  %v600_v3 = vld [vmem:[%s820_s0] sm:$0xff]   ;;  %v601_v4 = vld [vmem:[%s820_s0 + $0x8] sm:$0xff]  }
   0x3   :  { %36 = vst.msk [vmem:[#allocation2 + $0x20] sm:$0xff] %vm31_vm0, %v631_v0  ;;  %37 = vst.msk [vmem:[#allocation2 + $0x28] sm:$0xff] %vm31_vm0, %v631_v0  ;;  %561 = vmatpush3.bf16.msra.mxu0 %v598_v1  ;;  %v602_v5 = vld [vmem:[%s820_s0 + $0x10] sm:$0xff]   ;;  %v603_v6 = vld [vmem:[%s821_s3 + $0x18] sm:$0xff]  }
   0x4   :  { %562 = vmatprep.subr.bf16.mxu0 %v631_v0  ;;  %577 = vmatpush3.bf16.msra.mxu1 %v603_v6  ;;  %v604_v7 = vld [vmem:[%s821_s3 + $0x10] sm:$0xff]   ;;  %v605_v8 = vld [vmem:[%s821_s3 + $0x8] sm:$0xff]   ;;  %v606_v9 = vld [vmem:[%s821_s3] sm:$0xff]  }
   0x5   :  { %578 = vmatprep.subr.bf16.mxu1 %v631_v0  ;;  %v503_v10 = vld [vmem:[%s822_s2] ss:$0 sm:$0xff] }
   0x7   :  { %563 = vmatpush3.bf16.msra.mxu0 %v599_v2 }
   0x8   :  { %579 = vmatpush3.bf16.msra.mxu1 %v604_v7 }
   0x9   :  { %580 = vmatprep.subr.bf16.mxu1 %v631_v0 }
   0xa   :  { %565 = vmatmul.mubr.msk.bf16.vlgmr.msra.gmra.mxu0 %vm31_vm0, %v600_v3 }
   0xb   :  { %568 = vmatprep.mubr.msk.bf16.mxu0 %vm632_vm1, %v631_v0 }
   0xc   :  { %581 = vmatpush3.bf16.msra.mxu1 %v605_v8 }
   0xd   :  { %582 = vmatprep.subr.bf16.mxu1 %v631_v0 }
  0x10   :  { %583 = vmatpush3.bf16.msra.mxu1 %v606_v9 }
  0x12   :  { %569 = vmatmul.mubr.msk.bf16.gmra.mxu0 %vm31_vm0, %v601_v4 }
  0x13   :  { %572 = vmatprep.mubr.msk.bf16.mxu0 %vm632_vm1, %v631_v0 }
  0x1a   :  { %573 = vmatmul.mubr.msk.bf16.gmra.mxu0 %vm31_vm0, %v602_v5 }
  0xca   :  { %v126_v11 = vpop.f32.mrf.mxu0 }
  0xcb   :  { %v127_v12 = vadd.f32 %v503_v10, %v126_v11 }
  0xcc   :  { %v566_v13 = vpop.f32.mrf.mxu0 }
  0xcd   :  { %v155_v14 = vmul.f32 0.044715, %v127_v12  ;;  %v149_v62 = vmul.f32 0.5, %v127_v12 }
  0xce   :  { %v129_v15 = vpop.f32.mrf.mxu0 }
  0xcf   :  { %v161_v16 = vmul.f32 %v155_v14, %v127_v12  ;;  %v130_v17 = vadd.f32 %v503_v10, %v129_v15 }
  0xd0   :  { %v567_v18 = vpop.f32.mrf.mxu0 }
  0xd1   :  { %v167_v19 = vmul.f32 %v161_v16, %v127_v12  ;;  %v156_v20 = vmul.f32 0.044715, %v130_v17  ;;  %v150_v63 = vmul.f32 0.5, %v130_v17 }
  0xd2   :  { %v134_v21 = vpop.f32.mrf.mxu0 }
  0xd3   :  { %v173_v22 = vadd.f32 %v167_v19, %v127_v12  ;;  %v162_v23 = vmul.f32 %v156_v20, %v130_v17  ;;  %v135_v24 = vadd.f32 %v503_v10, %v134_v21 }
  0xd4   :  { %v570_v25 = vpop.f32.mrf.mxu0 }
  0xd5   :  { %v179_v26 = vmul.f32 0.7978845, %v173_v22  ;;  %v168_v27 = vmul.f32 %v162_v23, %v130_v17  ;;  %v157_v28 = vmul.f32 0.044715, %v135_v24  ;;  %v151_v8 = vmul.f32 0.5, %v135_v24  ;;  %v203_v23 = vld [vmem:[#allocation2] sm:$0xff] }
  0xd6   :  { %v137_v29 = vpop.f32.mrf.mxu0 }
  0xd7   :  { %607 = vtanh.f32 %v179_v26  ;;  %v174_v30 = vadd.f32 %v168_v27, %v130_v17  ;;  %v163_v31 = vmul.f32 %v157_v28, %v135_v24  ;;  %v138_v32 = vadd.f32 %v503_v10, %v137_v29  ;;  %v204_v27 = vld [vmem:[#allocation2 + $0x8] sm:$0xff] }
  0xd8   :  { %v571_v33 = vpop.f32.mrf.mxu0 }
  0xd9   :  { %v180_v34 = vmul.f32 0.7978845, %v174_v30  ;;  %v169_v35 = vmul.f32 %v163_v31, %v135_v24  ;;  %v158_v36 = vmul.f32 0.044715, %v138_v32  ;;  %v152_v9 = vmul.f32 0.5, %v138_v32  ;;  %v205_v31 = vld [vmem:[#allocation2 + $0x10] sm:$0xff] }
  0xda   :  { %v142_v37 = vpop.f32.mrf.mxu0  ;;  %v519_v33 = vld [vmem:[%s823_s4] ss:$0 sm:$0xff] }
  0xdb   :  { %609 = vtanh.f32 %v180_v34  ;;  %v175_v38 = vadd.f32 %v169_v35, %v135_v24  ;;  %v164_v39 = vmul.f32 %v158_v36, %v138_v32  ;;  %v143_v40 = vadd.f32 %v503_v10, %v142_v37  ;;  %v206_v37 = vld [vmem:[#allocation2 + $0x18] sm:$0xff] }
  0xdc   :  { %v574_v41 = vpop.f32.mrf.mxu0 }
  0xdd   :  { %v181_v42 = vmul.f32 0.7978845, %v175_v38  ;;  %v170_v43 = vmul.f32 %v164_v39, %v138_v32  ;;  %v159_v44 = vmul.f32 0.044715, %v143_v40  ;;  %v153_v17 = vmul.f32 0.5, %v143_v40 }
  0xde   :  { %v145_v45 = vpop.f32.mrf.mxu0 }
  0xdf   :  { %611 = vtanh.f32 %v181_v42  ;;  %v176_v46 = vadd.f32 %v170_v43, %v138_v32  ;;  %v165_v47 = vmul.f32 %v159_v44, %v143_v40  ;;  %v146_v48 = vadd.f32 %v503_v10, %v145_v45  ;;  %v207_v45 = vld [vmem:[#allocation2 + $0x20] sm:$0xff] }
  0xe0   :  { %v575_v49 = vpop.f32.mrf.mxu0 }
  0xe1   :  { %v182_v50 = vmul.f32 0.7978845, %v176_v46  ;;  %v171_v51 = vmul.f32 %v165_v47, %v143_v40  ;;  %v160_v52 = vmul.f32 0.044715, %v146_v48  ;;  %v154_v18 = vmul.f32 0.5, %v146_v48  ;;  %v546_v47 = vld [vmem:[%s820_s0 + $0x8] sm:$0xff]  }
  0xe3   :  { %613 = vtanh.f32 %v182_v50  ;;  %v177_v53 = vadd.f32 %v171_v51, %v143_v40  ;;  %v166_v54 = vmul.f32 %v160_v52, %v146_v48 }
  0xe4   :  { %v608_v55 = vpop.eup %607 }
  0xe5   :  { %v183_v56 = vmul.f32 0.7978845, %v177_v53  ;;  %v172_v57 = vmul.f32 %v166_v54, %v146_v48  ;;  %v191_v59 = vadd.f32 1.0, %v608_v55  ;;  %v540_v53 = vunpack.c.l.bf16 %v546_v47  ;;  %v208_v55 = vld [vmem:[#allocation2 + $0x28] sm:$0xff] }
  0xe7   :  { %615 = vtanh.f32 %v183_v56  ;;  %v178_v58 = vadd.f32 %v172_v57, %v146_v48  ;;  %v197_v2 = vmul.f32 %v191_v59, %v149_v62  ;;  %v541_v62 = vunpack.c.h.bf16 %v546_v47 }
  0xe8   :  { %v610_v60 = vpop.eup %609 }
  0xe9   :  { %v184_v61 = vmul.f32 0.7978845, %v178_v58  ;;  %v192_v1 = vadd.f32 1.0, %v610_v60 }
  0xeb   :  { %617 = vtanh.f32 %v184_v61  ;;  %v198_v3 = vmul.f32 %v192_v1, %v150_v63 }
  0xec   :  { %v612_v4 = vpop.eup %611 }
  0xed   :  { %v209_v5 = vpack.c.bf16 %v198_v3, %v197_v2  ;;  %v193_v6 = vadd.f32 1.0, %v612_v4  ;;  %v547_v2 = vld [vmem:[%s820_s0 + $0x10] sm:$0xff]  }
  0xef   :  { %585 = vmatmul.mubr.msk.bf16.vlgmr.msra.gmra.mxu1 %vm244_vm2, %v209_v5  ;;  %v199_v11 = vmul.f32 %v193_v6, %v151_v8  ;;  %v544_v6 = vunpack.c.l.bf16 %v547_v2 }
  0xf0   :  { %v614_v7 = vpop.eup %613  ;;  %588 = vmatprep.mubr.msk.bf16.mxu1 %vm632_vm1, %v631_v0 }
  0xf1   :  { %v194_v10 = vadd.f32 1.0, %v614_v7 }
  0xf3   :  { %v200_v12 = vmul.f32 %v194_v10, %v152_v9 }
  0xf4   :  { %v616_v13 = vpop.eup %615 }
  0xf5   :  { %v210_v14 = vpack.c.bf16 %v200_v12, %v199_v11  ;;  %v195_v15 = vadd.f32 1.0, %v616_v13  ;;  %v545_v11 = vunpack.c.h.bf16 %v547_v2 }
  0xf7   :  { %589 = vmatmul.mubr.msk.bf16.gmra.mxu1 %vm244_vm2, %v210_v14  ;;  %v201_v20 = vmul.f32 %v195_v15, %v153_v17 }
  0xf8   :  { %v618_v16 = vpop.eup %617  ;;  %592 = vmatprep.mubr.msk.bf16.mxu1 %vm632_vm1, %v631_v0  ;;  %v535_v0 = vld [vmem:[%s820_s0] sm:$0xff]  }
  0xf9   :  { %v196_v19 = vadd.f32 1.0, %v618_v16  ;;  %v536_v35 = vunpack.c.l.bf16 %v535_v0  ;;  %v537_v43 = vunpack.c.h.bf16 %v535_v0 }
  0xfb   :  { %v202_v21 = vmul.f32 %v196_v19, %v154_v18 }
  0xfd   :  { %v211_v22 = vpack.c.bf16 %v202_v21, %v201_v20 }
  0xff   :  { %593 = vmatmul.mubr.msk.bf16.gmra.mxu1 %vm244_vm2, %v211_v22 }
 0x1af   :  { %v288_v24 = vpop.f32.mrf.mxu1 }
 0x1b0   :  { %v311_v25 = vadd.f32 %v288_v24, %v203_v23 }
 0x1b1   :  { %v586_v26 = vpop.f32.mrf.mxu1 }
 0x1b2   :  { %317 = vst.msk [vmem:[#allocation2] sm:$0xff] %vm31_vm0, %v311_v25 }
 0x1b3   :  { %v291_v28 = vpop.f32.mrf.mxu1 }
 0x1b4   :  { %v312_v29 = vadd.f32 %v291_v28, %v204_v27 }
 0x1b5   :  { %v587_v30 = vpop.f32.mrf.mxu1 }
 0x1b6   :  { %318 = vst.msk [vmem:[#allocation2 + $0x8] sm:$0xff] %vm31_vm0, %v312_v29 }
 0x1b7   :  { %v296_v32 = vpop.f32.mrf.mxu1 }
 0x1b8   :  { %v313_v34 = vadd.f32 %v296_v32, %v205_v31 }
 0x1b9   :  { %v590_v36 = vpop.f32.mrf.mxu1  ;;  %v326_v38 = vld [vmem:[#allocation2] sm:$0xff] }
 0x1ba   :  { %319 = vst.msk [vmem:[#allocation2 + $0x10] sm:$0xff] %vm31_vm0, %v313_v34  ;;  %v339_v39 = vadd.f32 %v519_v33, %v326_v38 }
 0x1bb   :  { %v299_v40 = vpop.f32.mrf.mxu1 }
 0x1bc   :  { %v314_v41 = vadd.f32 %v299_v40, %v206_v37  ;;  %v357_v42 = vadd.f32 %v536_v35, %v339_v39 }
 0x1bd   :  { %v591_v44 = vpop.f32.mrf.mxu1  ;;  %v327_v46 = vld [vmem:[#allocation2 + $0x8] sm:$0xff] }
 0x1be   :  { %320 = vst.msk [vmem:[#allocation2 + $0x18] sm:$0xff] %vm31_vm0, %v314_v41  ;;  %v363_v48 = vsel %vm31_vm0, %v357_v42, 0.0  ;;  %v340_v49 = vadd.f32 %v519_v33, %v327_v46 }
 0x1bf   :  { %364 = vadd.xlane.f32.xlu0 %v363_v48  ;;  %v304_v50 = vpop.f32.mrf.mxu1 }
 0x1c0   :  { %v315_v51 = vadd.f32 %v304_v50, %v207_v45  ;;  %v358_v52 = vadd.f32 %v537_v43, %v340_v49 }
 0x1c1   :  { %v594_v54 = vpop.f32.mrf.mxu1  ;;  %v328_v56 = vld [vmem:[#allocation2 + $0x10] sm:$0xff] }
 0x1c2   :  { %321 = vst.msk [vmem:[#allocation2 + $0x20] sm:$0xff] %vm31_vm0, %v315_v51  ;;  %v366_v57 = vsel %vm31_vm0, %v358_v52, 0.0  ;;  %v341_v58 = vadd.f32 %v519_v33, %v328_v56 }
 0x1c3   :  { %367 = vadd.xlane.f32.xlu0 %v366_v57  ;;  %v307_v59 = vpop.f32.mrf.mxu1 }
 0x1c4   :  { %v316_v60 = vadd.f32 %v307_v59, %v208_v55  ;;  %v359_v61 = vadd.f32 %v540_v53, %v341_v58 }
 0x1c5   :  { %v595_v63 = vpop.f32.mrf.mxu1  ;;  %v329_v1 = vld [vmem:[#allocation2 + $0x18] sm:$0xff] }
 0x1c6   :  { %322 = vst.msk [vmem:[#allocation2 + $0x28] sm:$0xff] %vm31_vm0, %v316_v60  ;;  %v369_v3 = vsel %vm31_vm0, %v359_v61, 0.0  ;;  %v342_v4 = vadd.f32 %v519_v33, %v329_v1  ;;  %v521_v1 = vld [vmem:[%s825_s6] ss:$0 sm:$0xff] }
 0x1c7   :  { %370 = vadd.xlane.f32.xlu1 %v369_v3 }
 0x1c8   :  { %v360_v5 = vadd.f32 %v541_v62, %v342_v4 }
 0x1c9   :  { %v330_v7 = vld [vmem:[#allocation2 + $0x20] sm:$0xff] }
 0x1ca   :  { %v372_v8 = vsel %vm31_vm0, %v360_v5, 0.0  ;;  %v343_v9 = vadd.f32 %v519_v33, %v330_v7 }
 0x1cb   :  { %373 = vadd.xlane.f32.xlu1 %v372_v8 }
 0x1cc   :  { %v361_v10 = vadd.f32 %v544_v6, %v343_v9 }
 0x1cd   :  { %v331_v12 = vld [vmem:[#allocation2 + $0x28] sm:$0xff] }
 0x1ce   :  { %v375_v13 = vsel %vm31_vm0, %v361_v10, 0.0  ;;  %v344_v14 = vadd.f32 %v519_v33, %v331_v12 }
 0x1cf   :  { %376 = vadd.xlane.f32.xlu0 %v375_v13 }
 0x1d0   :  { %v362_v15 = vadd.f32 %v545_v11, %v344_v14 }
 0x1d2   :  { %v378_v16 = vsel %vm31_vm0, %v362_v15, 0.0 }
 0x1d3   :  { %379 = vadd.xlane.f32.xlu1 %v378_v16 }
 0x248   :  { %v365_v17 = vpop.xlane.xlu0 %364 }
 0x249   :  { %v382_v18 = vmul.f32 0.03125, %v365_v17 }
 0x24b   :  { %v388_v19 = vsub.f32 %v357_v42, %v382_v18 }
 0x24c   :  { %v368_v20 = vpop.xlane.xlu0 %367 }
 0x24d   :  { %v383_v21 = vmul.f32 0.03125, %v368_v20  ;;  %v394_v22 = vmul.f32 %v388_v19, %v388_v19 }
 0x24f   :  { %v389_v23 = vsub.f32 %v358_v52, %v383_v21  ;;  %v400_v24 = vsel %vm31_vm0, %v394_v22, 0.0 }
 0x250   :  { %v371_v25 = vpop.xlane.xlu1 %370  ;;  %401 = vadd.xlane.f32.xlu0 %v400_v24 }
 0x251   :  { %v384_v26 = vmul.f32 0.03125, %v371_v25  ;;  %v395_v27 = vmul.f32 %v389_v23, %v389_v23 }
 0x253   :  { %v764_v28 = vsub.f32 %v359_v61, %v384_v26  ;;  %v403_v29 = vsel %vm31_vm0, %v395_v27, 0.0  ;;  %v520_v61 = vld [vmem:[%s824_s5] ss:$0 sm:$0xff] }
 0x254   :  { %v374_v30 = vpop.xlane.xlu1 %373  ;;  %404 = vadd.xlane.f32.xlu1 %v403_v29 }
 0x255   :  { %v385_v31 = vmul.f32 0.03125, %v374_v30  ;;  %v396_v0 = vmul.f32 %v764_v28, %v764_v28 }
 0x257   :  { %v769_v32 = vsub.f32 %v360_v5, %v385_v31  ;;  %v406_v33 = vsel %vm31_vm0, %v396_v0, 0.0 }
 0x258   :  { %407 = vadd.xlane.f32.xlu0 %v406_v33  ;;  %v377_v34 = vpop.xlane.xlu0 %376 }
 0x259   :  { %v386_v35 = vmul.f32 0.03125, %v377_v34  ;;  %v397_v36 = vmul.f32 %v769_v32, %v769_v32 }
 0x25b   :  { %v774_v37 = vsub.f32 %v361_v10, %v386_v35  ;;  %v409_v38 = vsel %vm31_vm0, %v397_v36, 0.0 }
 0x25c   :  { %410 = vadd.xlane.f32.xlu1 %v409_v38  ;;  %v380_v39 = vpop.xlane.xlu1 %379 }
 0x25d   :  { %v387_v40 = vmul.f32 0.03125, %v380_v39  ;;  %v398_v41 = vmul.f32 %v774_v37, %v774_v37 }
 0x25f   :  { %v779_v42 = vsub.f32 %v362_v15, %v387_v40  ;;  %v412_v43 = vsel %vm31_vm0, %v398_v41, 0.0 }
 0x260   :  { %413 = vadd.xlane.f32.xlu0 %v412_v43 }
 0x261   :  { %v399_v44 = vmul.f32 %v779_v42, %v779_v42 }
 0x263   :  { %v415_v45 = vsel %vm31_vm0, %v399_v44, 0.0 }
 0x264   :  { %416 = vadd.xlane.f32.xlu1 %v415_v45 }
 0x2d9   :  { %v402_v46 = vpop.xlane.xlu0 %401 }
 0x2da   :  { %v418_v47 = vmul.f32 0.03125, %v402_v46 }
 0x2dc   :  { %v424_v48 = vadd.f32 1e-12, %v418_v47 }
 0x2dd   :  { %v405_v49 = vpop.xlane.xlu1 %404 }
 0x2de   :  { %619 = vrsqrt.f32 %v424_v48  ;;  %v419_v50 = vmul.f32 0.03125, %v405_v49 }
 0x2e0   :  { %v425_v51 = vadd.f32 1e-12, %v419_v50 }
 0x2e1   :  { %v408_v52 = vpop.xlane.xlu0 %407 }
 0x2e2   :  { %621 = vrsqrt.f32 %v425_v51  ;;  %v420_v53 = vmul.f32 0.03125, %v408_v52 }
 0x2e4   :  { %v426_v54 = vadd.f32 1e-12, %v420_v53 }
 0x2e5   :  { %v411_v55 = vpop.xlane.xlu1 %410 }
 0x2e6   :  { %623 = vrsqrt.f32 %v426_v54  ;;  %v421_v56 = vmul.f32 0.03125, %v411_v55 }
 0x2e8   :  { %v427_v57 = vadd.f32 1e-12, %v421_v56 }
 0x2e9   :  { %v414_v58 = vpop.xlane.xlu0 %413 }
 0x2ea   :  { %625 = vrsqrt.f32 %v427_v57  ;;  %v422_v59 = vmul.f32 0.03125, %v414_v58 }
 0x2eb   :  { %v620_v60 = vpop.eup %619 }
 0x2ec   :  { %v436_v62 = vmul.f32 %v620_v60, %v388_v19  ;;  %v428_v63 = vadd.f32 1e-12, %v422_v59 }
 0x2ed   :  { %v417_v2 = vpop.xlane.xlu1 %416 }
 0x2ee   :  { %v449_v3 = vmul.f32 %v520_v61, %v436_v62  ;;  %627 = vrsqrt.f32 %v428_v63  ;;  %v423_v4 = vmul.f32 0.03125, %v417_v2 }
 0x2ef   :  { %v622_v5 = vpop.eup %621 }
 0x2f0   :  { %v462_v6 = vadd.f32 %v521_v1, %v449_v3  ;;  %v437_v7 = vmul.f32 %v622_v5, %v389_v23  ;;  %v429_v8 = vadd.f32 1e-12, %v423_v4 }
 0x2f2   :  { %v528_v9 = vpack.c.bf16 %v462_v6, %v462_v6  ;;  %v450_v10 = vmul.f32 %v520_v61, %v437_v7  ;;  %629 = vrsqrt.f32 %v429_v8 }
 0x2f3   :  { %v624_v11 = vpop.eup %623 }
 0x2f4   :  { %493 = vst.msk [vmem:[%s826_s7] sm:$0xf] %vm492_vm3, %v528_v9  ;;  %v463_v12 = vadd.f32 %v521_v1, %v450_v10  ;;  %v438_v13 = vmul.f32 %v624_v11, %v764_v28 }
 0x2f6   :  { %v529_v14 = vpack.c.bf16 %v463_v12, %v463_v12  ;;  %v451_v15 = vmul.f32 %v520_v61, %v438_v13 }
 0x2f7   :  { %v626_v16 = vpop.eup %625 }
 0x2f8   :  { %494 = vst.msk [vmem:[%s826_s7 + $0x4] sm:$0xf] %vm492_vm3, %v529_v14  ;;  %v464_v17 = vadd.f32 %v521_v1, %v451_v15  ;;  %v439_v18 = vmul.f32 %v626_v16, %v769_v32 }
 0x2fa   :  { %v530_v19 = vpack.c.bf16 %v464_v17, %v464_v17  ;;  %v452_v20 = vmul.f32 %v520_v61, %v439_v18 }
 0x2fb   :  { %v628_v21 = vpop.eup %627 }
 0x2fc   :  { %495 = vst.msk [vmem:[%s826_s7 + $0x8] sm:$0xf] %vm492_vm3, %v530_v19  ;;  %v465_v22 = vadd.f32 %v521_v1, %v452_v20  ;;  %v440_v23 = vmul.f32 %v628_v21, %v774_v37 }
 0x2fe   :  { %v531_v24 = vpack.c.bf16 %v465_v22, %v465_v22  ;;  %v453_v25 = vmul.f32 %v520_v61, %v440_v23 }
 0x2ff   :  { %v630_v26 = vpop.eup %629 }
 0x300   :  { %496 = vst.msk [vmem:[%s826_s7 + $0xc] sm:$0xf] %vm492_vm3, %v531_v24  ;;  %v466_v27 = vadd.f32 %v521_v1, %v453_v25  ;;  %v441_v28 = vmul.f32 %v630_v26, %v779_v42 }
 0x302   :  { %v532_v29 = vpack.c.bf16 %v466_v27, %v466_v27  ;;  %v454_v30 = vmul.f32 %v520_v61, %v441_v28 }
 0x304   :  { %497 = vst.msk [vmem:[%s826_s7 + $0x10] sm:$0xf] %vm492_vm3, %v532_v29  ;;  %v467_v31 = vadd.f32 %v521_v1, %v454_v30 }
 0x306   :  { %v533_v0 = vpack.c.bf16 %v467_v31, %v467_v31 }
 0x308   :  { %498 = vst.msk [vmem:[%s826_s7 + $0x14] sm:$0xf] %vm492_vm3, %v533_v0 }

// kernel: bert_for_multiple_choice_forward.19
= control target key start
LH: loop header
LB: loop body
LE: loop exit
PB: predicated region body
PF: predicated region fallthrough
CT: control target
= control target key end

     0   :  { %vm19_vm0 = vcmask 259072   ;;  %v127_v0 = vmov 0.0   ;;  %vm128_vm1 = vmmov 0   ;;  %vm39_vm2 = vcmask 261120   ;;  %s166_s1 = inlined_call_operand.vmem [shape: bf16[32,32], index: 1, kind: input, shape index: {}]   ;;  %s167_s0 = inlined_call_operand.vmem [shape: bf16[6,32], index: 0, kind: input, shape index: {}]   ;;  %s168_s2 = inlined_call_operand.vmem [shape: f32[1,32], index: 2, kind: input, shape index: {}]   ;;  %s169_s3 = inlined_call_operand.vmem [shape: bf16[6,32], index: 3, kind: output, shape index: {}]  }
   0x1   :  { %20 = vst.msk [vmem:[#allocation2] sm:$0x3f] %vm19_vm0, %v127_v0  ;;  %113 = vmatprep.subr.bf16.mxu0 %v127_v0  ;;  %v123_v1 = vld [vmem:[%s166_s1 + $0x8] sm:$0xff]   ;;  %117 = vmatprep.mubr.msk.bf16.mxu0 %vm128_vm1, %v127_v0  ;;  %v124_v2 = vld [vmem:[%s166_s1] sm:$0xff]   ;;  %vm100_vm3 = vcmask 256000  }
   0x2   :  { %114 = vmatpush3.bf16.msra.mxu0 %v123_v1  ;;  %v22_v3 = vld [vmem:[%s167_s0] sm:$0x7] }
   0x3   :  { %115 = vmatprep.subr.bf16.mxu0 %v127_v0  ;;  %v109_v10 = vld [vmem:[%s168_s2] ss:$0 sm:$0xff] }
   0x6   :  { %116 = vmatpush3.bf16.msra.mxu0 %v124_v2 }
   0x8   :  { %v21_v4 = vld [vmem:[#allocation2] sm:$0x3f] }
   0x9   :  { %118 = vmatmul.mubr.msk.bf16.vlgmr.msra.gmra.mxu0 %vm39_vm2, %v22_v3 }
  0xc9   :  { %v77_v5 = vpop.f32.mrf.mxu0 }
  0xca   :  { %v83_v6 = vadd.f32 %v77_v5, %v21_v4 }
  0xcb   :  { %v119_v7 = vpop.f32.mrf.mxu0 }
  0xcc   :  { %85 = vst.msk [vmem:[#allocation2] sm:$0x3f] %vm19_vm0, %v83_v6 }
  0xcd   :  { %v80_v8 = vpop.f32.mrf.mxu0 }
  0xcf   :  { %v120_v9 = vpop.f32.mrf.mxu0 }
  0xd3   :  { %v89_v11 = vld [vmem:[#allocation2] sm:$0x3f] }
  0xd4   :  { %v97_v12 = vadd.f32 %v109_v10, %v89_v11 }
  0xd6   :  { %125 = vtanh.f32 %v97_v12 }
  0xe3   :  { %v126_v13 = vpop.eup %125 }
  0xe4   :  { %v99_v14 = vpack.c.bf16 %v126_v13, %v126_v13 }
  0xe6   :  { %101 = vst.msk [vmem:[%s169_s3] sm:$0x7] %vm100_vm3, %v99_v14 }

</bundles_post_ra>
